<compile_context>
chip_gen: v5e
topology: v5e:2x2
jax: 0.10.0
libtpu: 0.0.40
codegen_flags: <defaults>
</compile_context>

<pallas_src>
import jax
import jax.numpy as jnp
from jax.experimental import pallas as pl
from jax.experimental.pallas import tpu as pltpu

EPS = 1e-8  # gLN epsilon (Conv-TasNet style GlobalLayerNorm)


# ----------------------------------------------------------------------------
# Fully-fused Pallas kernel: all fusion repeats, both branches, residuals
# ----------------------------------------------------------------------------
def _make_fusion_kernel(fusion_repeats):
    R = fusion_repeats

    def gln_relu(y, gamma, beta, p):
        # y: (C, B*T); gamma/beta: (C, 1); p: (B*T, B*T) block-diag of 1/(C*T).
        # Single pass: sum and sum-of-squares together, segment-mean via matmul.
        colsum = jnp.sum(y, axis=0, keepdims=True)          # (1, B*T) sublane reduce
        colsq = jnp.sum(y * y, axis=0, keepdims=True)       # (1, B*T)
        mean = jnp.dot(colsum, p, preferred_element_type=jnp.float32)  # per-sample mean, bcast
        msq = jnp.dot(colsq, p, preferred_element_type=jnp.float32)    # per-sample E[y^2]
        var = msq - mean * mean
        inv = jax.lax.rsqrt(var + EPS)                      # EUP
        yn = (y - mean) * inv
        return jnp.maximum(gamma * yn + beta, 0.0)

    def kernel(a_ref, v_ref, awa_ref, awv_ref, ap_ref,
               vwa_ref, vwv_ref, vp_ref, down_ref, up_ref,
               pa_ref, pv_ref, o_ref):
        # a_ref : (Ca, B*Ta)  folded audio     v_ref : (Cv, B*Tv)  folded video
        # awa/awv : (R, Ca, Ca)/(R, Ca, Cv)    vwa/vwv : (R, Cv, Ca)/(R, Cv, Cv)
        # ap/vp  : (R, C, 3)  packed [bias | gamma | beta]
        # down   : (B*Ta, B*Tv) one-hot nearest-interp audio-time -> video-time
        # up     : (B*Tv, B*Ta) one-hot nearest-interp video-time -> audio-time
        # pa/pv  : (B*T, B*T) block-diagonal 1/(C*T) gLN segment-mean matrices
        a_res = a_ref[...]
        v_res = v_ref[...]
        down = down_ref[...]
        up = up_ref[...]
        pa = pa_ref[...]
        pv = pv_ref[...]

        a_cur = a_res
        v_cur = v_res
        a_fused = a_res
        for i in range(R):                      # static unroll over repeats
            video_fusion = i != R - 1
            # ---------------- video branch ----------------
            if video_fusion:
                a_down = jnp.dot(a_cur, down, preferred_element_type=jnp.float32)
                vp = vp_ref[i]                  # (Cv, 3)
                y_v = (jnp.dot(vwa_ref[i], a_down, preferred_element_type=jnp.float32)
                       + jnp.dot(vwv_ref[i], v_cur, preferred_element_type=jnp.float32)
                       + vp[:, 0:1])
                v_fused = gln_relu(y_v, vp[:, 1:2], vp[:, 2:3], pv)
            else:
                v_fused = v_cur
            # ---------------- audio branch ----------------
            v_up = jnp.dot(v_cur, up, preferred_element_type=jnp.float32)
            ap = ap_ref[i]                      # (Ca, 3)
            y_a = (jnp.dot(awa_ref[i], a_cur, preferred_element_type=jnp.float32)
                   + jnp.dot(awv_ref[i], v_up, preferred_element_type=jnp.float32)
                   + ap[:, 0:1])
            a_fused = gln_relu(y_a, ap[:, 1:2], ap[:, 2:3], pa)
            # residual re-injection for the next block
            if i < R - 1:
                a_cur = a_fused + a_res
                v_cur = v_fused + v_res

        o_ref[...] = a_fused.astype(o_ref.dtype)

    return kernel


# ----------------------------------------------------------------------------
# Host-side helpers: constant matrices (built once, tiny)
# ----------------------------------------------------------------------------
def _interp_matrix(b, t_in, t_out):
    """(B*t_in, B*t_out) one-hot: PyTorch 'nearest' src = floor(t * t_in / t_out)."""
    src = jnp.floor(jnp.arange(t_out) * (t_in / t_out)).astype(jnp.int32)
    onehot = (jnp.arange(t_in)[:, None] == src[None, :]).astype(jnp.float32)
    return jnp.kron(jnp.eye(b, dtype=jnp.float32), onehot)


def _gln_matrix(b, t, c):
    """(B*t, B*t) block-diagonal matrix of 1/(c*t): per-sample mean + broadcast."""
    blk = jnp.full((t, t), 1.0 / (c * t), dtype=jnp.float32)
    return jnp.kron(jnp.eye(b, dtype=jnp.float32), blk)


def multimodal_fusion_forward(audio, video, params, fusion_repeats=3):
    """audio: (B, Ca, Ta) f32, video: (B, Cv, Tv) f32 -> fused audio (B, Ca, Ta)."""
    B, Ca, Ta = audio.shape
    _, Cv, Tv = video.shape
    R = fusion_repeats

    # Fold batch into time -> lane-dense (C, B*T) layout.
    a_f = jnp.transpose(audio, (1, 0, 2)).reshape(Ca, B * Ta)
    v_f = jnp.transpose(video, (1, 0, 2)).reshape(Cv, B * Tv)

    # Stack per-repeat params; split the concat-conv weight into audio/video halves,
    # pack bias/gamma/beta into one (R, C, 3) array per branch.
    awa = jnp.stack([p["aw"][:, :Ca] for p in params])                       # (R, Ca, Ca)
    awv = jnp.stack([p["aw"][:, Ca:] for p in params])                       # (R, Ca, Cv)
    ap = jnp.stack([jnp.concatenate([p["ab"], p["ag"], p["abt"]], 1) for p in params])  # (R,Ca,3)
    vwa = jnp.stack([p["vw"][:, :Ca] for p in params])                       # (R, Cv, Ca)
    vwv = jnp.stack([p["vw"][:, Ca:] for p in params])                       # (R, Cv, Cv)
    vp = jnp.stack([jnp.concatenate([p["vb"], p["vg"], p["vbt"]], 1) for p in params])  # (R,Cv,3)

    down = _interp_matrix(B, Ta, Tv)      # audio time -> video time
    up = _interp_matrix(B, Tv, Ta)        # video time -> audio time
    pa = _gln_matrix(B, Ta, Ca)
    pv = _gln_matrix(B, Tv, Cv)

    def full(shape):
        return pl.BlockSpec(shape, lambda i, _s=shape: (0,) * len(_s))

    out_f = pl.pallas_call(
        _make_fusion_kernel(R),
        out_shape=jax.ShapeDtypeStruct((Ca, B * Ta), jnp.float32),
        grid=(1,),
        in_specs=[
            full((Ca, B * Ta)), full((Cv, B * Tv)),
            full((R, Ca, Ca)), full((R, Ca, Cv)), full((R, Ca, 3)),
            full((R, Cv, Ca)), full((R, Cv, Cv)), full((R, Cv, 3)),
            full((B * Ta, B * Tv)), full((B * Tv, B * Ta)),
            full((B * Ta, B * Ta)), full((B * Tv, B * Tv)),
        ],
        out_specs=full((Ca, B * Ta)),
        compiler_params=pltpu.CompilerParams(dimension_semantics=("arbitrary",)),
    )(a_f, v_f, awa, awv, ap, vwa, vwv, vp, down, up, pa, pv)

    # Unfold (Ca, B*Ta) -> (B, Ca, Ta).
    return jnp.transpose(out_f.reshape(Ca, B, Ta), (1, 0, 2))


# ----------------------------------------------------------------------------
# Pure-JAX reference (for correctness check)
# ----------------------------------------------------------------------------
def nearest_interp_1d(x, out_len):
    tin = x.shape[-1]
    idx = jnp.floor(jnp.arange(out_len) * (tin / out_len)).astype(jnp.int32)
    return x[:, :, idx]


def _ref_block(x, w, b, g, bt):
    y = jnp.einsum("oc,bct->bot", w, x) + b[None, :, :]
    mean = jnp.mean(y, axis=(1, 2), keepdims=True)
    var = jnp.mean((y - mean) ** 2, axis=(1, 2), keepdims=True)
    yn = (y - mean) / jnp.sqrt(var + EPS)
    return jnp.maximum(g[None, :, :] * yn + bt[None, :, :], 0.0)


def multimodal_fusion_ref(audio, video, params, fusion_repeats=3):
    ar, vr = audio, video
    af, vf = None, None
    for i in range(fusion_repeats):
        video_fusion = i != fusion_repeats - 1
        a_in = audio if i == 0 else af + ar
        v_in = video if i == 0 else vf + vr
        p = params[i]
        if video_fusion:
            a_i = nearest_interp_1d(a_in, v_in.shape[-1])
            vf = _ref_block(jnp.concatenate([a_i, v_in], axis=1),
                            p["vw"], p["vb"], p["vg"], p["vbt"])
        else:
            vf = v_in
        v_i = nearest_interp_1d(v_in, a_in.shape[-1])
        af = _ref_block(jnp.concatenate([a_in, v_i], axis=1),
                        p["aw"], p["ab"], p["ag"], p["abt"])
    return af


# ----------------------------------------------------------------------------
# Deterministic parameter construction
# ----------------------------------------------------------------------------
def make_params(key, ca, cv, fusion_repeats=3):
    params = []
    cin = ca + cv
    for _ in range(fusion_repeats):
        key, *ks = jax.random.split(key, 9)
        params.append({
            "aw": 0.1 * jax.random.normal(ks[0], (ca, cin), jnp.float32),
            "ab": 0.05 * jax.random.normal(ks[1], (ca, 1), jnp.float32),
            "ag": 1.0 + 0.1 * jax.random.normal(ks[2], (ca, 1), jnp.float32),
            "abt": 0.1 * jax.random.normal(ks[3], (ca, 1), jnp.float32),
            # video-branch conv params (unused on the last block, video_fusion=False)
            "vw": 0.1 * jax.random.normal(ks[4], (cv, cin), jnp.float32),
            "vb": 0.05 * jax.random.normal(ks[5], (cv, 1), jnp.float32),
            "vg": 1.0 + 0.1 * jax.random.normal(ks[6], (cv, 1), jnp.float32),
            "vbt": 0.1 * jax.random.normal(ks[7], (cv, 1), jnp.float32),
        })
    return params


if __name__ == "__main__":
    B, Ca, Cv, Ta, Tv = 2, 8, 8, 64, 16     # B*Ta = 128 -> lane-dense output
    key = jax.random.PRNGKey(0)
    kp, ka, kv = jax.random.split(key, 3)

    params = make_params(kp, Ca, Cv, fusion_repeats=3)
    audio = jax.random.normal(ka, (B, Ca, Ta), jnp.float32)   # (B, audio_bn_chan, Ta)
    video = jax.random.normal(kv, (B, Cv, Tv), jnp.float32)   # (B, video_bn_chan, Tv)

    out = multimodal_fusion_forward(audio, video, params, fusion_repeats=3)
    out = jax.block_until_ready(out)

    ref = multimodal_fusion_ref(audio, video, params, fusion_repeats=3)
    assert out.shape == (B, Ca, Ta)
    assert jnp.allclose(out, ref, atol=2e-4, rtol=2e-4), "mismatch vs pure-JAX reference"

    print("KERNEL_OK")
</pallas_src>

<mosaic_0001>
module attributes {stable_mosaic.version = 11 : i64} {
  func.func @kernel(%arg0: i32, %arg1: memref<8x128xf32, #tpu.memory_space<vmem>>, %arg2: memref<8x32xf32, #tpu.memory_space<vmem>>, %arg3: memref<3x8x8xf32, #tpu.memory_space<vmem>>, %arg4: memref<3x8x8xf32, #tpu.memory_space<vmem>>, %arg5: memref<3x8x3xf32, #tpu.memory_space<vmem>>, %arg6: memref<3x8x8xf32, #tpu.memory_space<vmem>>, %arg7: memref<3x8x8xf32, #tpu.memory_space<vmem>>, %arg8: memref<3x8x3xf32, #tpu.memory_space<vmem>>, %arg9: memref<128x32xf32, #tpu.memory_space<vmem>>, %arg10: memref<32x128xf32, #tpu.memory_space<vmem>>, %arg11: memref<128x128xf32, #tpu.memory_space<vmem>>, %arg12: memref<32x32xf32, #tpu.memory_space<vmem>>, %arg13: memref<8x128xf32, #tpu.memory_space<vmem>>) attributes {dimension_semantics = [#tpu.dimension_semantics<arbitrary>], iteration_bounds = array<i64: 1>, scalar_prefetch = 0 : i64, scratch_operands = 0 : i64, tpu.core_type = #tpu.core_type<tc>, window_params = [{pipeline_mode = #tpu.pipeline_mode<synchronous>, transform_indices = @transform_0, window_bounds = array<i64: 8, 128>}, {pipeline_mode = #tpu.pipeline_mode<synchronous>, transform_indices = @transform_1, window_bounds = array<i64: 8, 32>}, {pipeline_mode = #tpu.pipeline_mode<synchronous>, transform_indices = @transform_2, window_bounds = array<i64: 3, 8, 8>}, {pipeline_mode = #tpu.pipeline_mode<synchronous>, transform_indices = @transform_3, window_bounds = array<i64: 3, 8, 8>}, {pipeline_mode = #tpu.pipeline_mode<synchronous>, transform_indices = @transform_4, window_bounds = array<i64: 3, 8, 3>}, {pipeline_mode = #tpu.pipeline_mode<synchronous>, transform_indices = @transform_5, window_bounds = array<i64: 3, 8, 8>}, {pipeline_mode = #tpu.pipeline_mode<synchronous>, transform_indices = @transform_6, window_bounds = array<i64: 3, 8, 8>}, {pipeline_mode = #tpu.pipeline_mode<synchronous>, transform_indices = @transform_7, window_bounds = array<i64: 3, 8, 3>}, {pipeline_mode = #tpu.pipeline_mode<synchronous>, transform_indices = @transform_8, window_bounds = array<i64: 128, 32>}, {pipeline_mode = #tpu.pipeline_mode<synchronous>, transform_indices = @transform_9, window_bounds = array<i64: 32, 128>}, {pipeline_mode = #tpu.pipeline_mode<synchronous>, transform_indices = @transform_10, window_bounds = array<i64: 128, 128>}, {pipeline_mode = #tpu.pipeline_mode<synchronous>, transform_indices = @transform_11, window_bounds = array<i64: 32, 32>}, {pipeline_mode = #tpu.pipeline_mode<synchronous>, transform_indices = @transform_12, window_bounds = array<i64: 8, 128>}]} {
    %c0 = arith.constant 0 : index
    %c0_0 = arith.constant 0 : index
    %0 = vector.load %arg1[%c0, %c0_0] : memref<8x128xf32, #tpu.memory_space<vmem>>, vector<8x128xf32>
    %c0_1 = arith.constant 0 : index
    %c0_2 = arith.constant 0 : index
    %1 = vector.load %arg2[%c0_1, %c0_2] : memref<8x32xf32, #tpu.memory_space<vmem>>, vector<8x32xf32>
    %c0_3 = arith.constant 0 : index
    %c0_4 = arith.constant 0 : index
    %2 = vector.load %arg9[%c0_3, %c0_4] : memref<128x32xf32, #tpu.memory_space<vmem>>, vector<128x32xf32>
    %c0_5 = arith.constant 0 : index
    %c0_6 = arith.constant 0 : index
    %3 = vector.load %arg10[%c0_5, %c0_6] : memref<32x128xf32, #tpu.memory_space<vmem>>, vector<32x128xf32>
    %c0_7 = arith.constant 0 : index
    %c0_8 = arith.constant 0 : index
    %4 = vector.load %arg11[%c0_7, %c0_8] : memref<128x128xf32, #tpu.memory_space<vmem>>, vector<128x128xf32>
    %c0_9 = arith.constant 0 : index
    %c0_10 = arith.constant 0 : index
    %5 = vector.load %arg12[%c0_9, %c0_10] : memref<32x32xf32, #tpu.memory_space<vmem>>, vector<32x32xf32>
    %cst = arith.constant dense<0.000000e+00> : vector<8x32xf32>
    %6 = tpu.matmul %0, %2, %cst {dimension_numbers = #tpu.dot_dimension_numbers<[1], [0], [0], [1], [0, 0, 1, 1], [], []>} : vector<8x128xf32>, vector<128x32xf32>, vector<8x32xf32> -> vector<8x32xf32>
    %c0_11 = arith.constant 0 : index
    %c0_12 = arith.constant 0 : index
    %c0_13 = arith.constant 0 : index
    %7 = vector.load %arg8[%c0_11, %c0_12, %c0_13] : memref<3x8x3xf32, #tpu.memory_space<vmem>>, vector<1x8x3xf32>
    %8 = vector.shape_cast %7 : vector<1x8x3xf32> to vector<8x3xf32>
    %c0_14 = arith.constant 0 : index
    %c0_15 = arith.constant 0 : index
    %c0_16 = arith.constant 0 : index
    %9 = vector.load %arg6[%c0_14, %c0_15, %c0_16] : memref<3x8x8xf32, #tpu.memory_space<vmem>>, vector<1x8x8xf32>
    %10 = vector.shape_cast %9 : vector<1x8x8xf32> to vector<8x8xf32>
    %cst_17 = arith.constant dense<0.000000e+00> : vector<8x32xf32>
    %11 = tpu.matmul %10, %6, %cst_17 {dimension_numbers = #tpu.dot_dimension_numbers<[1], [0], [0], [1], [0, 0, 1, 1], [], []>} : vector<8x8xf32>, vector<8x32xf32>, vector<8x32xf32> -> vector<8x32xf32>
    %c0_18 = arith.constant 0 : index
    %c0_19 = arith.constant 0 : index
    %c0_20 = arith.constant 0 : index
    %12 = vector.load %arg7[%c0_18, %c0_19, %c0_20] : memref<3x8x8xf32, #tpu.memory_space<vmem>>, vector<1x8x8xf32>
    %13 = vector.shape_cast %12 : vector<1x8x8xf32> to vector<8x8xf32>
    %cst_21 = arith.constant dense<0.000000e+00> : vector<8x32xf32>
    %14 = tpu.matmul %13, %1, %cst_21 {dimension_numbers = #tpu.dot_dimension_numbers<[1], [0], [0], [1], [0, 0, 1, 1], [], []>} : vector<8x8xf32>, vector<8x32xf32>, vector<8x32xf32> -> vector<8x32xf32>
    %15 = arith.addf %11, %14 : vector<8x32xf32>
    %16 = vector.extract_strided_slice %8 {offsets = [0, 0], sizes = [8, 1], strides = [1, 1]} : vector<8x3xf32> to vector<8x1xf32>
    %17 = vector.broadcast %16 : vector<8x1xf32> to vector<8x32xf32>
    %18 = arith.addf %15, %17 : vector<8x32xf32>
    %19 = vector.extract_strided_slice %8 {offsets = [0, 1], sizes = [8, 1], strides = [1, 1]} : vector<8x3xf32> to vector<8x1xf32>
    %20 = vector.extract_strided_slice %8 {offsets = [0, 2], sizes = [8, 1], strides = [1, 1]} : vector<8x3xf32> to vector<8x1xf32>
    %cst_22 = arith.constant dense<0.000000e+00> : vector<32xf32>
    %21 = vector.multi_reduction <add>, %18, %cst_22 [0] : vector<8x32xf32> to vector<32xf32>
    %22 = vector.shape_cast %21 : vector<32xf32> to vector<1x32xf32>
    %23 = arith.mulf %18, %18 : vector<8x32xf32>
    %cst_23 = arith.constant dense<0.000000e+00> : vector<32xf32>
    %24 = vector.multi_reduction <add>, %23, %cst_23 [0] : vector<8x32xf32> to vector<32xf32>
    %25 = vector.shape_cast %24 : vector<32xf32> to vector<1x32xf32>
    %cst_24 = arith.constant dense<0.000000e+00> : vector<1x32xf32>
    %26 = tpu.matmul %22, %5, %cst_24 {dimension_numbers = #tpu.dot_dimension_numbers<[1], [0], [0], [1], [0, 0, 1, 1], [], []>} : vector<1x32xf32>, vector<32x32xf32>, vector<1x32xf32> -> vector<1x32xf32>
    %cst_25 = arith.constant dense<0.000000e+00> : vector<1x32xf32>
    %27 = tpu.matmul %25, %5, %cst_25 {dimension_numbers = #tpu.dot_dimension_numbers<[1], [0], [0], [1], [0, 0, 1, 1], [], []>} : vector<1x32xf32>, vector<32x32xf32>, vector<1x32xf32> -> vector<1x32xf32>
    %28 = arith.mulf %26, %26 : vector<1x32xf32>
    %29 = arith.subf %27, %28 : vector<1x32xf32>
    %cst_26 = arith.constant 9.99999993E-9 : f32
    %30 = vector.broadcast %cst_26 : f32 to vector<1x32xf32>
    %31 = arith.addf %29, %30 : vector<1x32xf32>
    %32 = math.rsqrt %31 : vector<1x32xf32>
    %33 = vector.broadcast %26 : vector<1x32xf32> to vector<8x32xf32>
    %34 = arith.subf %18, %33 : vector<8x32xf32>
    %35 = vector.broadcast %32 : vector<1x32xf32> to vector<8x32xf32>
    %36 = arith.mulf %34, %35 : vector<8x32xf32>
    %37 = vector.broadcast %19 : vector<8x1xf32> to vector<8x32xf32>
    %38 = arith.mulf %37, %36 : vector<8x32xf32>
    %39 = vector.broadcast %20 : vector<8x1xf32> to vector<8x32xf32>
    %40 = arith.addf %38, %39 : vector<8x32xf32>
    %cst_27 = arith.constant 0.000000e+00 : f32
    %41 = vector.broadcast %cst_27 : f32 to vector<8x32xf32>
    %42 = arith.maximumf %40, %41 : vector<8x32xf32>
    %cst_28 = arith.constant dense<0.000000e+00> : vector<8x128xf32>
    %43 = tpu.matmul %1, %3, %cst_28 {dimension_numbers = #tpu.dot_dimension_numbers<[1], [0], [0], [1], [0, 0, 1, 1], [], []>} : vector<8x32xf32>, vector<32x128xf32>, vector<8x128xf32> -> vector<8x128xf32>
    %c0_29 = arith.constant 0 : index
    %c0_30 = arith.constant 0 : index
    %c0_31 = arith.constant 0 : index
    %44 = vector.load %arg5[%c0_29, %c0_30, %c0_31] : memref<3x8x3xf32, #tpu.memory_space<vmem>>, vector<1x8x3xf32>
    %45 = vector.shape_cast %44 : vector<1x8x3xf32> to vector<8x3xf32>
    %c0_32 = arith.constant 0 : index
    %c0_33 = arith.constant 0 : index
    %c0_34 = arith.constant 0 : index
    %46 = vector.load %arg3[%c0_32, %c0_33, %c0_34] : memref<3x8x8xf32, #tpu.memory_space<vmem>>, vector<1x8x8xf32>
    %47 = vector.shape_cast %46 : vector<1x8x8xf32> to vector<8x8xf32>
    %cst_35 = arith.constant dense<0.000000e+00> : vector<8x128xf32>
    %48 = tpu.matmul %47, %0, %cst_35 {dimension_numbers = #tpu.dot_dimension_numbers<[1], [0], [0], [1], [0, 0, 1, 1], [], []>} : vector<8x8xf32>, vector<8x128xf32>, vector<8x128xf32> -> vector<8x128xf32>
    %c0_36 = arith.constant 0 : index
    %c0_37 = arith.constant 0 : index
    %c0_38 = arith.constant 0 : index
    %49 = vector.load %arg4[%c0_36, %c0_37, %c0_38] : memref<3x8x8xf32, #tpu.memory_space<vmem>>, vector<1x8x8xf32>
    %50 = vector.shape_cast %49 : vector<1x8x8xf32> to vector<8x8xf32>
    %cst_39 = arith.constant dense<0.000000e+00> : vector<8x128xf32>
    %51 = tpu.matmul %50, %43, %cst_39 {dimension_numbers = #tpu.dot_dimension_numbers<[1], [0], [0], [1], [0, 0, 1, 1], [], []>} : vector<8x8xf32>, vector<8x128xf32>, vector<8x128xf32> -> vector<8x128xf32>
    %52 = arith.addf %48, %51 : vector<8x128xf32>
    %53 = vector.extract_strided_slice %45 {offsets = [0, 0], sizes = [8, 1], strides = [1, 1]} : vector<8x3xf32> to vector<8x1xf32>
    %54 = vector.broadcast %53 : vector<8x1xf32> to vector<8x128xf32>
    %55 = arith.addf %52, %54 : vector<8x128xf32>
    %56 = vector.extract_strided_slice %45 {offsets = [0, 1], sizes = [8, 1], strides = [1, 1]} : vector<8x3xf32> to vector<8x1xf32>
    %57 = vector.extract_strided_slice %45 {offsets = [0, 2], sizes = [8, 1], strides = [1, 1]} : vector<8x3xf32> to vector<8x1xf32>
    %cst_40 = arith.constant dense<0.000000e+00> : vector<128xf32>
    %58 = vector.multi_reduction <add>, %55, %cst_40 [0] : vector<8x128xf32> to vector<128xf32>
    %59 = vector.shape_cast %58 : vector<128xf32> to vector<1x128xf32>
    %60 = arith.mulf %55, %55 : vector<8x128xf32>
    %cst_41 = arith.constant dense<0.000000e+00> : vector<128xf32>
    %61 = vector.multi_reduction <add>, %60, %cst_41 [0] : vector<8x128xf32> to vector<128xf32>
    %62 = vector.shape_cast %61 : vector<128xf32> to vector<1x128xf32>
    %cst_42 = arith.constant dense<0.000000e+00> : vector<1x128xf32>
    %63 = tpu.matmul %59, %4, %cst_42 {dimension_numbers = #tpu.dot_dimension_numbers<[1], [0], [0], [1], [0, 0, 1, 1], [], []>} : vector<1x128xf32>, vector<128x128xf32>, vector<1x128xf32> -> vector<1x128xf32>
    %cst_43 = arith.constant dense<0.000000e+00> : vector<1x128xf32>
    %64 = tpu.matmul %62, %4, %cst_43 {dimension_numbers = #tpu.dot_dimension_numbers<[1], [0], [0], [1], [0, 0, 1, 1], [], []>} : vector<1x128xf32>, vector<128x128xf32>, vector<1x128xf32> -> vector<1x128xf32>
    %65 = arith.mulf %63, %63 : vector<1x128xf32>
    %66 = arith.subf %64, %65 : vector<1x128xf32>
    %cst_44 = arith.constant 9.99999993E-9 : f32
    %67 = vector.broadcast %cst_44 : f32 to vector<1x128xf32>
    %68 = arith.addf %66, %67 : vector<1x128xf32>
    %69 = math.rsqrt %68 : vector<1x128xf32>
    %70 = vector.broadcast %63 : vector<1x128xf32> to vector<8x128xf32>
    %71 = arith.subf %55, %70 : vector<8x128xf32>
    %72 = vector.broadcast %69 : vector<1x128xf32> to vector<8x128xf32>
    %73 = arith.mulf %71, %72 : vector<8x128xf32>
    %74 = vector.broadcast %56 : vector<8x1xf32> to vector<8x128xf32>
    %75 = arith.mulf %74, %73 : vector<8x128xf32>
    %76 = vector.broadcast %57 : vector<8x1xf32> to vector<8x128xf32>
    %77 = arith.addf %75, %76 : vector<8x128xf32>
    %cst_45 = arith.constant 0.000000e+00 : f32
    %78 = vector.broadcast %cst_45 : f32 to vector<8x128xf32>
    %79 = arith.maximumf %77, %78 : vector<8x128xf32>
    %80 = arith.addf %79, %0 : vector<8x128xf32>
    %81 = arith.addf %42, %1 : vector<8x32xf32>
    %cst_46 = arith.constant dense<0.000000e+00> : vector<8x32xf32>
    %82 = tpu.matmul %80, %2, %cst_46 {dimension_numbers = #tpu.dot_dimension_numbers<[1], [0], [0], [1], [0, 0, 1, 1], [], []>} : vector<8x128xf32>, vector<128x32xf32>, vector<8x32xf32> -> vector<8x32xf32>
    %c1 = arith.constant 1 : index
    %c0_47 = arith.constant 0 : index
    %c0_48 = arith.constant 0 : index
    %83 = vector.load %arg8[%c1, %c0_47, %c0_48] : memref<3x8x3xf32, #tpu.memory_space<vmem>>, vector<1x8x3xf32>
    %84 = vector.shape_cast %83 : vector<1x8x3xf32> to vector<8x3xf32>
    %c1_49 = arith.constant 1 : index
    %c0_50 = arith.constant 0 : index
    %c0_51 = arith.constant 0 : index
    %85 = vector.load %arg6[%c1_49, %c0_50, %c0_51] : memref<3x8x8xf32, #tpu.memory_space<vmem>>, vector<1x8x8xf32>
    %86 = vector.shape_cast %85 : vector<1x8x8xf32> to vector<8x8xf32>
    %cst_52 = arith.constant dense<0.000000e+00> : vector<8x32xf32>
    %87 = tpu.matmul %86, %82, %cst_52 {dimension_numbers = #tpu.dot_dimension_numbers<[1], [0], [0], [1], [0, 0, 1, 1], [], []>} : vector<8x8xf32>, vector<8x32xf32>, vector<8x32xf32> -> vector<8x32xf32>
    %c1_53 = arith.constant 1 : index
    %c0_54 = arith.constant 0 : index
    %c0_55 = arith.constant 0 : index
    %88 = vector.load %arg7[%c1_53, %c0_54, %c0_55] : memref<3x8x8xf32, #tpu.memory_space<vmem>>, vector<1x8x8xf32>
    %89 = vector.shape_cast %88 : vector<1x8x8xf32> to vector<8x8xf32>
    %cst_56 = arith.constant dense<0.000000e+00> : vector<8x32xf32>
    %90 = tpu.matmul %89, %81, %cst_56 {dimension_numbers = #tpu.dot_dimension_numbers<[1], [0], [0], [1], [0, 0, 1, 1], [], []>} : vector<8x8xf32>, vector<8x32xf32>, vector<8x32xf32> -> vector<8x32xf32>
    %91 = arith.addf %87, %90 : vector<8x32xf32>
    %92 = vector.extract_strided_slice %84 {offsets = [0, 0], sizes = [8, 1], strides = [1, 1]} : vector<8x3xf32> to vector<8x1xf32>
    %93 = vector.broadcast %92 : vector<8x1xf32> to vector<8x32xf32>
    %94 = arith.addf %91, %93 : vector<8x32xf32>
    %95 = vector.extract_strided_slice %84 {offsets = [0, 1], sizes = [8, 1], strides = [1, 1]} : vector<8x3xf32> to vector<8x1xf32>
    %96 = vector.extract_strided_slice %84 {offsets = [0, 2], sizes = [8, 1], strides = [1, 1]} : vector<8x3xf32> to vector<8x1xf32>
    %cst_57 = arith.constant dense<0.000000e+00> : vector<32xf32>
    %97 = vector.multi_reduction <add>, %94, %cst_57 [0] : vector<8x32xf32> to vector<32xf32>
    %98 = vector.shape_cast %97 : vector<32xf32> to vector<1x32xf32>
    %99 = arith.mulf %94, %94 : vector<8x32xf32>
    %cst_58 = arith.constant dense<0.000000e+00> : vector<32xf32>
    %100 = vector.multi_reduction <add>, %99, %cst_58 [0] : vector<8x32xf32> to vector<32xf32>
    %101 = vector.shape_cast %100 : vector<32xf32> to vector<1x32xf32>
    %cst_59 = arith.constant dense<0.000000e+00> : vector<1x32xf32>
    %102 = tpu.matmul %98, %5, %cst_59 {dimension_numbers = #tpu.dot_dimension_numbers<[1], [0], [0], [1], [0, 0, 1, 1], [], []>} : vector<1x32xf32>, vector<32x32xf32>, vector<1x32xf32> -> vector<1x32xf32>
    %cst_60 = arith.constant dense<0.000000e+00> : vector<1x32xf32>
    %103 = tpu.matmul %101, %5, %cst_60 {dimension_numbers = #tpu.dot_dimension_numbers<[1], [0], [0], [1], [0, 0, 1, 1], [], []>} : vector<1x32xf32>, vector<32x32xf32>, vector<1x32xf32> -> vector<1x32xf32>
    %104 = arith.mulf %102, %102 : vector<1x32xf32>
    %105 = arith.subf %103, %104 : vector<1x32xf32>
    %cst_61 = arith.constant 9.99999993E-9 : f32
    %106 = vector.broadcast %cst_61 : f32 to vector<1x32xf32>
    %107 = arith.addf %105, %106 : vector<1x32xf32>
    %108 = math.rsqrt %107 : vector<1x32xf32>
    %109 = vector.broadcast %102 : vector<1x32xf32> to vector<8x32xf32>
    %110 = arith.subf %94, %109 : vector<8x32xf32>
    %111 = vector.broadcast %108 : vector<1x32xf32> to vector<8x32xf32>
    %112 = arith.mulf %110, %111 : vector<8x32xf32>
    %113 = vector.broadcast %95 : vector<8x1xf32> to vector<8x32xf32>
    %114 = arith.mulf %113, %112 : vector<8x32xf32>
    %115 = vector.broadcast %96 : vector<8x1xf32> to vector<8x32xf32>
    %116 = arith.addf %114, %115 : vector<8x32xf32>
    %cst_62 = arith.constant 0.000000e+00 : f32
    %117 = vector.broadcast %cst_62 : f32 to vector<8x32xf32>
    %118 = arith.maximumf %116, %117 : vector<8x32xf32>
    %cst_63 = arith.constant dense<0.000000e+00> : vector<8x128xf32>
    %119 = tpu.matmul %81, %3, %cst_63 {dimension_numbers = #tpu.dot_dimension_numbers<[1], [0], [0], [1], [0, 0, 1, 1], [], []>} : vector<8x32xf32>, vector<32x128xf32>, vector<8x128xf32> -> vector<8x128xf32>
    %c1_64 = arith.constant 1 : index
    %c0_65 = arith.constant 0 : index
    %c0_66 = arith.constant 0 : index
    %120 = vector.load %arg5[%c1_64, %c0_65, %c0_66] : memref<3x8x3xf32, #tpu.memory_space<vmem>>, vector<1x8x3xf32>
    %121 = vector.shape_cast %120 : vector<1x8x3xf32> to vector<8x3xf32>
    %c1_67 = arith.constant 1 : index
    %c0_68 = arith.constant 0 : index
    %c0_69 = arith.constant 0 : index
    %122 = vector.load %arg3[%c1_67, %c0_68, %c0_69] : memref<3x8x8xf32, #tpu.memory_space<vmem>>, vector<1x8x8xf32>
    %123 = vector.shape_cast %122 : vector<1x8x8xf32> to vector<8x8xf32>
    %cst_70 = arith.constant dense<0.000000e+00> : vector<8x128xf32>
    %124 = tpu.matmul %123, %80, %cst_70 {dimension_numbers = #tpu.dot_dimension_numbers<[1], [0], [0], [1], [0, 0, 1, 1], [], []>} : vector<8x8xf32>, vector<8x128xf32>, vector<8x128xf32> -> vector<8x128xf32>
    %c1_71 = arith.constant 1 : index
    %c0_72 = arith.constant 0 : index
    %c0_73 = arith.constant 0 : index
    %125 = vector.load %arg4[%c1_71, %c0_72, %c0_73] : memref<3x8x8xf32, #tpu.memory_space<vmem>>, vector<1x8x8xf32>
    %126 = vector.shape_cast %125 : vector<1x8x8xf32> to vector<8x8xf32>
    %cst_74 = arith.constant dense<0.000000e+00> : vector<8x128xf32>
    %127 = tpu.matmul %126, %119, %cst_74 {dimension_numbers = #tpu.dot_dimension_numbers<[1], [0], [0], [1], [0, 0, 1, 1], [], []>} : vector<8x8xf32>, vector<8x128xf32>, vector<8x128xf32> -> vector<8x128xf32>
    %128 = arith.addf %124, %127 : vector<8x128xf32>
    %129 = vector.extract_strided_slice %121 {offsets = [0, 0], sizes = [8, 1], strides = [1, 1]} : vector<8x3xf32> to vector<8x1xf32>
    %130 = vector.broadcast %129 : vector<8x1xf32> to vector<8x128xf32>
    %131 = arith.addf %128, %130 : vector<8x128xf32>
    %132 = vector.extract_strided_slice %121 {offsets = [0, 1], sizes = [8, 1], strides = [1, 1]} : vector<8x3xf32> to vector<8x1xf32>
    %133 = vector.extract_strided_slice %121 {offsets = [0, 2], sizes = [8, 1], strides = [1, 1]} : vector<8x3xf32> to vector<8x1xf32>
    %cst_75 = arith.constant dense<0.000000e+00> : vector<128xf32>
    %134 = vector.multi_reduction <add>, %131, %cst_75 [0] : vector<8x128xf32> to vector<128xf32>
    %135 = vector.shape_cast %134 : vector<128xf32> to vector<1x128xf32>
    %136 = arith.mulf %131, %131 : vector<8x128xf32>
    %cst_76 = arith.constant dense<0.000000e+00> : vector<128xf32>
    %137 = vector.multi_reduction <add>, %136, %cst_76 [0] : vector<8x128xf32> to vector<128xf32>
    %138 = vector.shape_cast %137 : vector<128xf32> to vector<1x128xf32>
    %cst_77 = arith.constant dense<0.000000e+00> : vector<1x128xf32>
    %139 = tpu.matmul %135, %4, %cst_77 {dimension_numbers = #tpu.dot_dimension_numbers<[1], [0], [0], [1], [0, 0, 1, 1], [], []>} : vector<1x128xf32>, vector<128x128xf32>, vector<1x128xf32> -> vector<1x128xf32>
    %cst_78 = arith.constant dense<0.000000e+00> : vector<1x128xf32>
    %140 = tpu.matmul %138, %4, %cst_78 {dimension_numbers = #tpu.dot_dimension_numbers<[1], [0], [0], [1], [0, 0, 1, 1], [], []>} : vector<1x128xf32>, vector<128x128xf32>, vector<1x128xf32> -> vector<1x128xf32>
    %141 = arith.mulf %139, %139 : vector<1x128xf32>
    %142 = arith.subf %140, %141 : vector<1x128xf32>
    %cst_79 = arith.constant 9.99999993E-9 : f32
    %143 = vector.broadcast %cst_79 : f32 to vector<1x128xf32>
    %144 = arith.addf %142, %143 : vector<1x128xf32>
    %145 = math.rsqrt %144 : vector<1x128xf32>
    %146 = vector.broadcast %139 : vector<1x128xf32> to vector<8x128xf32>
    %147 = arith.subf %131, %146 : vector<8x128xf32>
    %148 = vector.broadcast %145 : vector<1x128xf32> to vector<8x128xf32>
    %149 = arith.mulf %147, %148 : vector<8x128xf32>
    %150 = vector.broadcast %132 : vector<8x1xf32> to vector<8x128xf32>
    %151 = arith.mulf %150, %149 : vector<8x128xf32>
    %152 = vector.broadcast %133 : vector<8x1xf32> to vector<8x128xf32>
    %153 = arith.addf %151, %152 : vector<8x128xf32>
    %cst_80 = arith.constant 0.000000e+00 : f32
    %154 = vector.broadcast %cst_80 : f32 to vector<8x128xf32>
    %155 = arith.maximumf %153, %154 : vector<8x128xf32>
    %156 = arith.addf %155, %0 : vector<8x128xf32>
    %157 = arith.addf %118, %1 : vector<8x32xf32>
    %cst_81 = arith.constant dense<0.000000e+00> : vector<8x128xf32>
    %158 = tpu.matmul %157, %3, %cst_81 {dimension_numbers = #tpu.dot_dimension_numbers<[1], [0], [0], [1], [0, 0, 1, 1], [], []>} : vector<8x32xf32>, vector<32x128xf32>, vector<8x128xf32> -> vector<8x128xf32>
    %c2 = arith.constant 2 : index
    %c0_82 = arith.constant 0 : index
    %c0_83 = arith.constant 0 : index
    %159 = vector.load %arg5[%c2, %c0_82, %c0_83] : memref<3x8x3xf32, #tpu.memory_space<vmem>>, vector<1x8x3xf32>
    %160 = vector.shape_cast %159 : vector<1x8x3xf32> to vector<8x3xf32>
    %c2_84 = arith.constant 2 : index
    %c0_85 = arith.constant 0 : index
    %c0_86 = arith.constant 0 : index
    %161 = vector.load %arg3[%c2_84, %c0_85, %c0_86] : memref<3x8x8xf32, #tpu.memory_space<vmem>>, vector<1x8x8xf32>
    %162 = vector.shape_cast %161 : vector<1x8x8xf32> to vector<8x8xf32>
    %cst_87 = arith.constant dense<0.000000e+00> : vector<8x128xf32>
    %163 = tpu.matmul %162, %156, %cst_87 {dimension_numbers = #tpu.dot_dimension_numbers<[1], [0], [0], [1], [0, 0, 1, 1], [], []>} : vector<8x8xf32>, vector<8x128xf32>, vector<8x128xf32> -> vector<8x128xf32>
    %c2_88 = arith.constant 2 : index
    %c0_89 = arith.constant 0 : index
    %c0_90 = arith.constant 0 : index
    %164 = vector.load %arg4[%c2_88, %c0_89, %c0_90] : memref<3x8x8xf32, #tpu.memory_space<vmem>>, vector<1x8x8xf32>
    %165 = vector.shape_cast %164 : vector<1x8x8xf32> to vector<8x8xf32>
    %cst_91 = arith.constant dense<0.000000e+00> : vector<8x128xf32>
    %166 = tpu.matmul %165, %158, %cst_91 {dimension_numbers = #tpu.dot_dimension_numbers<[1], [0], [0], [1], [0, 0, 1, 1], [], []>} : vector<8x8xf32>, vector<8x128xf32>, vector<8x128xf32> -> vector<8x128xf32>
    %167 = arith.addf %163, %166 : vector<8x128xf32>
    %168 = vector.extract_strided_slice %160 {offsets = [0, 0], sizes = [8, 1], strides = [1, 1]} : vector<8x3xf32> to vector<8x1xf32>
    %169 = vector.broadcast %168 : vector<8x1xf32> to vector<8x128xf32>
    %170 = arith.addf %167, %169 : vector<8x128xf32>
    %171 = vector.extract_strided_slice %160 {offsets = [0, 1], sizes = [8, 1], strides = [1, 1]} : vector<8x3xf32> to vector<8x1xf32>
    %172 = vector.extract_strided_slice %160 {offsets = [0, 2], sizes = [8, 1], strides = [1, 1]} : vector<8x3xf32> to vector<8x1xf32>
    %cst_92 = arith.constant dense<0.000000e+00> : vector<128xf32>
    %173 = vector.multi_reduction <add>, %170, %cst_92 [0] : vector<8x128xf32> to vector<128xf32>
    %174 = vector.shape_cast %173 : vector<128xf32> to vector<1x128xf32>
    %175 = arith.mulf %170, %170 : vector<8x128xf32>
    %cst_93 = arith.constant dense<0.000000e+00> : vector<128xf32>
    %176 = vector.multi_reduction <add>, %175, %cst_93 [0] : vector<8x128xf32> to vector<128xf32>
    %177 = vector.shape_cast %176 : vector<128xf32> to vector<1x128xf32>
    %cst_94 = arith.constant dense<0.000000e+00> : vector<1x128xf32>
    %178 = tpu.matmul %174, %4, %cst_94 {dimension_numbers = #tpu.dot_dimension_numbers<[1], [0], [0], [1], [0, 0, 1, 1], [], []>} : vector<1x128xf32>, vector<128x128xf32>, vector<1x128xf32> -> vector<1x128xf32>
    %cst_95 = arith.constant dense<0.000000e+00> : vector<1x128xf32>
    %179 = tpu.matmul %177, %4, %cst_95 {dimension_numbers = #tpu.dot_dimension_numbers<[1], [0], [0], [1], [0, 0, 1, 1], [], []>} : vector<1x128xf32>, vector<128x128xf32>, vector<1x128xf32> -> vector<1x128xf32>
    %180 = arith.mulf %178, %178 : vector<1x128xf32>
    %181 = arith.subf %179, %180 : vector<1x128xf32>
    %cst_96 = arith.constant 9.99999993E-9 : f32
    %182 = vector.broadcast %cst_96 : f32 to vector<1x128xf32>
    %183 = arith.addf %181, %182 : vector<1x128xf32>
    %184 = math.rsqrt %183 : vector<1x128xf32>
    %185 = vector.broadcast %178 : vector<1x128xf32> to vector<8x128xf32>
    %186 = arith.subf %170, %185 : vector<8x128xf32>
    %187 = vector.broadcast %184 : vector<1x128xf32> to vector<8x128xf32>
    %188 = arith.mulf %186, %187 : vector<8x128xf32>
    %189 = vector.broadcast %171 : vector<8x1xf32> to vector<8x128xf32>
    %190 = arith.mulf %189, %188 : vector<8x128xf32>
    %191 = vector.broadcast %172 : vector<8x1xf32> to vector<8x128xf32>
    %192 = arith.addf %190, %191 : vector<8x128xf32>
    %cst_97 = arith.constant 0.000000e+00 : f32
    %193 = vector.broadcast %cst_97 : f32 to vector<8x128xf32>
    %194 = arith.maximumf %192, %193 : vector<8x128xf32>
    %c0_98 = arith.constant 0 : index
    %c0_99 = arith.constant 0 : index
    %195 = vector.load %arg13[%c0_98, %c0_99] : memref<8x128xf32, #tpu.memory_space<vmem>>, vector<8x128xf32>
    tpu.vector_store %arg13[%c0_98, %c0_99], %194 {strides = array<i32>} : memref<8x128xf32, #tpu.memory_space<vmem>>, vector<8x128xf32>,
    return
  }
  func.func @transform_0(%arg0: i32) -> (i32, i32) {
    %c0_i32 = arith.constant 0 : i32
    %c0_i32_0 = arith.constant 0 : i32
    %c0_i32_1 = arith.constant 0 : i32
    return %c0_i32, %c0_i32_0 : i32, i32
  }
  func.func @transform_1(%arg0: i32) -> (i32, i32) {
    %c0_i32 = arith.constant 0 : i32
    %c0_i32_0 = arith.constant 0 : i32
    %c0_i32_1 = arith.constant 0 : i32
    return %c0_i32, %c0_i32_0 : i32, i32
  }
  func.func @transform_2(%arg0: i32) -> (i32, i32, i32) {
    %c0_i32 = arith.constant 0 : i32
    %c0_i32_0 = arith.constant 0 : i32
    %c0_i32_1 = arith.constant 0 : i32
    %c0_i32_2 = arith.constant 0 : i32
    return %c0_i32, %c0_i32_0, %c0_i32_1 : i32, i32, i32
  }
  func.func @transform_3(%arg0: i32) -> (i32, i32, i32) {
    %c0_i32 = arith.constant 0 : i32
    %c0_i32_0 = arith.constant 0 : i32
    %c0_i32_1 = arith.constant 0 : i32
    %c0_i32_2 = arith.constant 0 : i32
    return %c0_i32, %c0_i32_0, %c0_i32_1 : i32, i32, i32
  }
  func.func @transform_4(%arg0: i32) -> (i32, i32, i32) {
    %c0_i32 = arith.constant 0 : i32
    %c0_i32_0 = arith.constant 0 : i32
    %c0_i32_1 = arith.constant 0 : i32
    %c0_i32_2 = arith.constant 0 : i32
    return %c0_i32, %c0_i32_0, %c0_i32_1 : i32, i32, i32
  }
  func.func @transform_5(%arg0: i32) -> (i32, i32, i32) {
    %c0_i32 = arith.constant 0 : i32
    %c0_i32_0 = arith.constant 0 : i32
    %c0_i32_1 = arith.constant 0 : i32
    %c0_i32_2 = arith.constant 0 : i32
    return %c0_i32, %c0_i32_0, %c0_i32_1 : i32, i32, i32
  }
  func.func @transform_6(%arg0: i32) -> (i32, i32, i32) {
    %c0_i32 = arith.constant 0 : i32
    %c0_i32_0 = arith.constant 0 : i32
    %c0_i32_1 = arith.constant 0 : i32
    %c0_i32_2 = arith.constant 0 : i32
    return %c0_i32, %c0_i32_0, %c0_i32_1 : i32, i32, i32
  }
  func.func @transform_7(%arg0: i32) -> (i32, i32, i32) {
    %c0_i32 = arith.constant 0 : i32
    %c0_i32_0 = arith.constant 0 : i32
    %c0_i32_1 = arith.constant 0 : i32
    %c0_i32_2 = arith.constant 0 : i32
    return %c0_i32, %c0_i32_0, %c0_i32_1 : i32, i32, i32
  }
  func.func @transform_8(%arg0: i32) -> (i32, i32) {
    %c0_i32 = arith.constant 0 : i32
    %c0_i32_0 = arith.constant 0 : i32
    %c0_i32_1 = arith.constant 0 : i32
    return %c0_i32, %c0_i32_0 : i32, i32
  }
  func.func @transform_9(%arg0: i32) -> (i32, i32) {
    %c0_i32 = arith.constant 0 : i32
    %c0_i32_0 = arith.constant 0 : i32
    %c0_i32_1 = arith.constant 0 : i32
    return %c0_i32, %c0_i32_0 : i32, i32
  }
  func.func @transform_10(%arg0: i32) -> (i32, i32) {
    %c0_i32 = arith.constant 0 : i32
    %c0_i32_0 = arith.constant 0 : i32
    %c0_i32_1 = arith.constant 0 : i32
    return %c0_i32, %c0_i32_0 : i32, i32
  }
  func.func @transform_11(%arg0: i32) -> (i32, i32) {
    %c0_i32 = arith.constant 0 : i32
    %c0_i32_0 = arith.constant 0 : i32
    %c0_i32_1 = arith.constant 0 : i32
    return %c0_i32, %c0_i32_0 : i32, i32
  }
  func.func @transform_12(%arg0: i32) -> (i32, i32) {
    %c0_i32 = arith.constant 0 : i32
    %c0_i32_0 = arith.constant 0 : i32
    %c0_i32_1 = arith.constant 0 : i32
    return %c0_i32, %c0_i32_0 : i32, i32
  }
}

</mosaic_0001>

<bundles_post_ra>
// kernel: tpu_custom_call.1
= control target key start
LH: loop header
LB: loop body
LE: loop exit
PB: predicated region body
PF: predicated region fallthrough
CT: control target
= control target key end

     0   :  { %17 = vsyncpa [#allocation3], 0  ;;  %s1718_s0 = inlined_call_operand.hbm [shape: f32[8,128], index: 0, kind: input, shape index: {}]   ;;  %s1719_s1 = inlined_call_operand.hbm [shape: f32[8,32], index: 1, kind: input, shape index: {}]   ;;  %s1720_s2 = inlined_call_operand.hbm [shape: f32[3,8,8], index: 2, kind: input, shape index: {}]   ;;  %s1721_s3 = inlined_call_operand.hbm [shape: f32[3,8,8], index: 3, kind: input, shape index: {}]   ;;  %s1722_s4 = inlined_call_operand.vmem [shape: f32[3,8,3], index: 4, kind: input, shape index: {}]   ;;  %s1723_s5 = inlined_call_operand.hbm [shape: f32[3,8,8], index: 5, kind: input, shape index: {}]   ;;  %s1724_s6 = inlined_call_operand.hbm [shape: f32[3,8,8], index: 6, kind: input, shape index: {}]   ;;  %s1725_s7 = inlined_call_operand.vmem [shape: f32[3,8,3], index: 7, kind: input, shape index: {}]   ;;  %s1726_s8 = inlined_call_operand.vmem [shape: f32[128,32], index: 8, kind: input, shape index: {}]   ;;  %s1727_s9 = inlined_call_operand.vmem [shape: f32[32,128], index: 9, kind: input, shape index: {}]   ;;  %s1728_s10 = inlined_call_operand.vmem [shape: f32[128,128], index: 10, kind: input, shape index: {}]   ;;  %s1729_s11 = inlined_call_operand.vmem [shape: f32[32,32], index: 11, kind: input, shape index: {}]   ;;  %s1730_s12 = inlined_call_operand.hbm [shape: f32[8,128], index: 12, kind: output, shape index: {}]  }
   0x1   :  { %18 = vsyncpa [#allocation6], 0 }
   0x2   :  { %19 = vsyncpa [#allocation9], 0 }
   0x3   :  { %20 = vsyncpa [#allocation12], 0  ;;  %s38_s23 = sshll.u32 %s1719_s1, 4  ;;  %s39_s23 = int_to_ptr.hbm [resolvable:$true] %s38_s23 }
   0x4   :  { %21 = vsyncpa [#allocation4], 0  ;;  %s1247_s24 = smov [#allocation5]   ;;  %s61_s28 = sshll.u32 %s1721_s3, 4  ;;  %s62_s28 = int_to_ptr.hbm [resolvable:$true] %s61_s28 }
   0x5   :  { %s40_s25 = sshll.u32 %s1247_s24, 4  ;;  %s1248_s29 = smov [#allocation8]   ;;  %s41_s25 = int_to_ptr.vmem [resolvable:$true] %s40_s25 }
   0x6   :  { %43 = dma.hbm_to_vmem [thread:$0]  %s39_s23, 128, %s41_s25, [#allocation6]  }
   0x7   :  { %s63_s30 = sshll.u32 %s1248_s29, 4  ;;  %s27_s15 = sshll.u32 %s1718_s0, 4  ;;  %s64_s30 = int_to_ptr.vmem [resolvable:$true] %s63_s30  ;;  %s28_s15 = int_to_ptr.hbm [resolvable:$true] %s27_s15 }
   0x8   :  { %s1249_s1 = smov 128   ;;  %s1250_s16 = smov 8  }
   0x9   :  { %69 = dma.hbm_to_vmem [thread:$0]  %s62_s28, 384, %s64_s30, [#allocation9], %s1249_s1, %s1249_s1, %s1250_s16  }
   0xa   :  { %s48_s19 = sshll.u32 %s1720_s2, 4  ;;  %s1251_s20 = smov [#allocation2]   ;;  %s49_s19 = int_to_ptr.hbm [resolvable:$true] %s48_s19 }
   0xb   :  { %s29_s21 = sshll.u32 %s1251_s20, 4  ;;  %s1252_s3 = smov [#allocation7]   ;;  %s30_s21 = int_to_ptr.vmem [resolvable:$true] %s29_s21 }
   0xc   :  { %32 = dma.hbm_to_vmem [thread:$0]  %s28_s15, 128, %s30_s21, [#allocation3]  }
   0xd   :  { %s50_s22 = sshll.u32 %s1252_s3, 4  ;;  %s76_s0 = sshll.u32 %s1723_s5, 4  ;;  %s51_s22 = int_to_ptr.vmem [resolvable:$true] %s50_s22  ;;  %s77_s0 = int_to_ptr.hbm [resolvable:$true] %s76_s0 }
   0xe   :  { %56 = dma.hbm_to_vmem [thread:$0]  %s49_s19, 384, %s51_s22, [#allocation6], %s1249_s1, %s1249_s1, %s1250_s16  }
   0xf   :  { %s89_s27 = sshll.u32 %s1724_s6, 4  ;;  %s1253_s28 = smov [#allocation10]   ;;  %s90_s27 = int_to_ptr.hbm [resolvable:$true] %s89_s27 }
  0x10   :  { %s78_s2 = sshll.u32 %s1253_s28, 4  ;;  %s1254_s29 = smov [#allocation11]   ;;  %s79_s2 = int_to_ptr.vmem [resolvable:$true] %s78_s2 }
  0x11   :  { %84 = dma.hbm_to_vmem [thread:$0]  %s77_s0, 384, %s79_s2, [#allocation9], %s1249_s1, %s1249_s1, %s1250_s16  }
  0x12   :  { %s91_s30 = sshll.u32 %s1254_s29, 4  ;;  %s92_s30 = int_to_ptr.vmem [resolvable:$true] %s91_s30 }
  0x13   :  { %97 = dma.hbm_to_vmem [thread:$0]  %s90_s27, 384, %s92_s30, [#allocation12], %s1249_s1, %s1249_s1, %s1250_s16  }
  0x14   :  { %1237 = dma.done.wait [#allocation3], 128  }
  0x15   :  { %1238 = vsyncadd [#allocation3], 4294967168 }
  0x16   :  { %1239 = dma.done.wait [#allocation6], 512  }
  0x17   :  { %1240 = vsyncadd [#allocation6], 4294966784 }
  0x18   :  { %1241 = dma.done.wait [#allocation9], 768  }
  0x19   :  { %1242 = vsyncadd [#allocation9], 4294966528 }
  0x1a   :  { %1243 = dma.done.wait [#allocation12], 384  }
  0x1b   :  { %1244 = vsyncadd [#allocation12], 4294966912  ;;  %v149_v0 = vld [vmem:[%s1726_s8 + $0x78] sm:$0xff]  ;;  %v148_v1 = vld [vmem:[%s1726_s8 + $0x70] sm:$0xff]  ;;  %vm197_vm0 = vcmask 64512   ;;  %v1255_v20 = vmov 0  }
  0x1c   :  { %174 = vmatpush.msra.mxu0 %v149_v0  ;;  %v147_v2 = vld [vmem:[%s1726_s8 + $0x68] sm:$0xff]  ;;  %v146_v3 = vld [vmem:[%s1726_s8 + $0x60] sm:$0xff]  ;;  %v145_v5 = vld [vmem:[%s1726_s8 + $0x58] sm:$0xff]  ;;  %1047 = vset.pattern.permute.xlu0 %v1255_v20  ;;  %vm250_vm1 = vcmask 261120   ;;  %v1256_v35 = vmov 1   ;;  %v1257_v36 = vmov 2  }
  0x1d   :  { %v1354_v4 = vld [vmem:[#allocation2] sm:$0xff]  ;;  %v144_v6 = vld [vmem:[%s1726_s8 + $0x50] sm:$0xff]  ;;  %v143_v7 = vld [vmem:[%s1726_s8 + $0x48] sm:$0xff]  ;;  %1050 = vset.pattern.permute.xlu2 %v1256_v35  ;;  %1048 = vset.pattern.permute.xlu1 %v1256_v35  ;;  %s1002_s21 = sshll.u32 %s1730_s12, 4  ;;  %s1003_s21 = int_to_ptr.hbm [resolvable:$true] %s1002_s21 }
  0x1e   :  { %175 = vmatpush.msra.mxu0 %v148_v1  ;;  %407 = vmatpush.msra.mxu1 %v1354_v4  ;;  %v142_v8 = vld [vmem:[%s1726_s8 + $0x40] sm:$0xff]  ;;  %v141_v9 = vld [vmem:[%s1726_s8 + $0x38] sm:$0xff]  ;;  %v140_v10 = vld [vmem:[%s1726_s8 + $0x30] sm:$0xff] }
  0x1f   :  { %v139_v11 = vld [vmem:[%s1726_s8 + $0x28] sm:$0xff]  ;;  %v138_v12 = vld [vmem:[%s1726_s8 + $0x20] sm:$0xff]  ;;  %v137_v13 = vld [vmem:[%s1726_s8 + $0x18] sm:$0xff] }
  0x20   :  { %176 = vmatpush.msra.mxu0 %v147_v2  ;;  %501 = vmatpush.msrb.mxu1 %v149_v0  ;;  %v136_v14 = vld [vmem:[%s1726_s8 + $0x10] sm:$0xff]  ;;  %v135_v15 = vld [vmem:[%s1726_s8 + $0x8] sm:$0xff]  ;;  %v134_v16 = vld [vmem:[%s1726_s8] sm:$0xff] }
  0x21   :  { %v1394_v17 = vld [vmem:[#allocation5] sm:$0xff]  ;;  %v196_v18 = vld [vmem:[#allocation11] sm:$0xff]  ;;  %v194_v19 = vld [vmem:[%s1725_s7] sm:$0xff] }
  0x22   :  { %177 = vmatpush.msra.mxu0 %v146_v3  ;;  %502 = vmatpush.msrb.mxu1 %v148_v1  ;;  %v363_v21 = vld [vmem:[%s1722_s4] sm:$0xff]  ;;  %v1408_v22 = vld [vmem:[%s1725_s7 + $0x8] sm:$0xff]  ;;  %v1414_v25 = vld [vmem:[%s1727_s9 + $0x18] sm:$0xff] }
  0x23   :  { %216 = vmatpush.msra.mxu3 %v1394_v17  ;;  %246 = vperm.xlu0 %1047, %v194_v19   ;;  %v195_v23 = vld [vmem:[#allocation10] sm:$0xff]  ;;  %v1420_v26 = vld [vmem:[%s1727_s9 + $0x10] sm:$0xff]  ;;  %v1426_v27 = vld [vmem:[%s1727_s9 + $0x8] sm:$0xff] }
  0x24   :  { %178 = vmatpush.msra.mxu0 %v145_v5  ;;  %503 = vmatpush.msrb.mxu1 %v147_v2  ;;  %v1432_v28 = vld [vmem:[%s1727_s9] sm:$0xff]  ;;  %v1441_v29 = vld [vmem:[%s1729_s11 + $0x18] sm:$0xff]  ;;  %v1446_v30 = vld [vmem:[%s1729_s11 + $0x10] sm:$0xff] }
  0x25   :  { %1015 = vmatmul.msk.f32.vlgmr.msra.gmra.mxu3 %vm197_vm0, %v196_v18  ;;  %v1453_v31 = vld [vmem:[%s1729_s11 + $0x8] sm:$0xff]  ;;  %v1460_v32 = vld [vmem:[%s1729_s11] sm:$0xff]  ;;  %v364_v33 = vld [vmem:[#allocation7] sm:$0xff]  ;;  %330 = vperm.xlu2 %1050, %v194_v19  }
  0x26   :  { %179 = vmatpush.msra.mxu0 %v144_v6  ;;  %504 = vmatpush.msrb.mxu1 %v146_v3  ;;  %v1469_v34 = vld [vmem:[%s1728_s10 + $0x78] sm:$0xff]  ;;  %v365_v58 = vld [vmem:[#allocation8] sm:$0xff]  ;;  %v1493_v59 = vld [vmem:[%s1728_s10 + $0x70] sm:$0xff] }
  0x27   :  { %281 = vmatpush.msrb.mxu3 %v1441_v29  ;;  %1021 = vmatmul.msk.f32.vlgmr.msra.gmra.mxu1 %vm197_vm0, %v364_v33  ;;  %v1499_v60 = vld [vmem:[%s1728_s10 + $0x68] sm:$0xff]  ;;  %v1507_v61 = vld [vmem:[%s1728_s10 + $0x60] sm:$0xff]  ;;  %v1514_v62 = vld [vmem:[%s1728_s10 + $0x58] sm:$0xff] }
  0x28   :  { %180 = vmatpush.msra.mxu0 %v143_v7  ;;  %505 = vmatpush.msrb.mxu1 %v145_v5  ;;  %v1521_v63 = vld [vmem:[%s1728_s10 + $0x50] sm:$0xff]  ;;  %v1528_v0 = vld [vmem:[%s1728_s10 + $0x48] sm:$0xff]  ;;  %v1535_v1 = vld [vmem:[%s1728_s10 + $0x40] sm:$0xff] }
  0x29   :  { %282 = vmatpush.msrb.mxu3 %v1446_v30  ;;  %489 = vperm.xlu1 %1048, %v363_v21   ;;  %v1542_v2 = vld [vmem:[%s1728_s10 + $0x38] sm:$0xff]  ;;  %v1549_v3 = vld [vmem:[%s1728_s10 + $0x30] sm:$0xff]  ;;  %v1556_v5 = vld [vmem:[%s1728_s10 + $0x28] sm:$0xff] }
  0x2a   :  { %181 = vmatpush.msra.mxu0 %v142_v8  ;;  %506 = vmatpush.msrb.mxu1 %v144_v6  ;;  %v1563_v6 = vld [vmem:[%s1728_s10 + $0x20] sm:$0xff] }
  0x2b   :  { %414 = vperm.xlu0 %1047, %v363_v21   ;;  %283 = vmatpush.msrb.mxu3 %v1453_v31 }
  0x2c   :  { %182 = vmatpush.msra.mxu0 %v141_v9  ;;  %507 = vmatpush.msrb.mxu1 %v143_v7  ;;  %v1570_v7 = vld [vmem:[%s1728_s10 + $0x18] sm:$0xff] }
  0x2d   :  { %284 = vmatpush.msrb.mxu3 %v1460_v32  ;;  %1051 = vset.pattern.permute.xlu2 %v1257_v36 }
  0x2e   :  { %183 = vmatpush.msra.mxu0 %v140_v10  ;;  %508 = vmatpush.msrb.mxu1 %v142_v8  ;;  %v1576_v8 = vld [vmem:[%s1728_s10 + $0x10] sm:$0xff] }
  0x2f   :  { %335 = vperm.xlu2 %1051, %v194_v19  }
  0x30   :  { %184 = vmatpush.msra.mxu0 %v139_v11  ;;  %509 = vmatpush.msrb.mxu1 %v141_v9  ;;  %v1584_v9 = vld [vmem:[%s1728_s10 + $0x8] sm:$0xff] }
  0x31   :  { %1049 = vset.pattern.permute.xlu1 %v1257_v36 }
  0x32   :  { %185 = vmatpush.msra.mxu0 %v138_v12  ;;  %510 = vmatpush.msrb.mxu1 %v140_v10  ;;  %v1591_v10 = vld [vmem:[%s1728_s10] sm:$0xff] }
  0x33   :  { %575 = vperm.xlu0 %1047, %v1408_v22   ;;  %494 = vperm.xlu1 %1049, %v363_v21  }
  0x34   :  { %186 = vmatpush.msra.mxu0 %v137_v13  ;;  %511 = vmatpush.msrb.mxu1 %v139_v11 }
  0x36   :  { %187 = vmatpush.msra.mxu0 %v136_v14  ;;  %512 = vmatpush.msrb.mxu1 %v138_v12 }
  0x37   :  { %1053 = vset.pattern.permute.xlu2 %v1256_v35 }
  0x38   :  { %188 = vmatpush.msra.mxu0 %v135_v15  ;;  %513 = vmatpush.msrb.mxu1 %v137_v13 }
  0x39   :  { %658 = vperm.xlu2 %1053, %v1408_v22  }
  0x3a   :  { %189 = vmatpush.msra.mxu0 %v134_v16  ;;  %514 = vmatpush.msrb.mxu1 %v136_v14 }
  0x3b   :  { %190 = vmatmul.f32.vlgmr.msra.gmra.mxu0 %v1354_v4  ;;  %1054 = vset.pattern.permute.xlu0 %v1257_v36 }
  0x3c   :  { %515 = vmatpush.msrb.mxu1 %v135_v15  ;;  %304 = vmatpush.msrb.mxu0 %v1441_v29 }
  0x3d   :  { %663 = vperm.xlu0 %1054, %v1408_v22   ;;  %1052 = vset.pattern.permute.xlu1 %v1255_v20 }
  0x3e   :  { %516 = vmatpush.msrb.mxu1 %v134_v16  ;;  %305 = vmatpush.msrb.mxu0 %v1446_v30 }
  0x40   :  { %306 = vmatpush.msrb.mxu0 %v1453_v31 }
  0x41   :  { %1056 = vset.pattern.permute.xlu2 %v1257_v36 }
  0x42   :  { %307 = vmatpush.msrb.mxu0 %v1460_v32 }
  0x95   :  { %v247_v40 = vpop.permute.xlu0 %246 }
  0x9d   :  { %v415_v21 = vpop.permute.xlu0 %414 }
  0xa4   :  { %v409_v16 = vpop.f32.mrf.mxu1 }
  0xa8   :  { %v218_v37 = vpop.f32.mrf.mxu3 }
  0xb8   :  { %v191_v24 = vpop.f32.mrf.mxu0 }
  0xb9   :  { %239 = vmatpush.msra.mxu2 %v191_v24 }
  0xba   :  { %1016 = vmatmul.msk.f32.vlgmr.msra.gmra.mxu2 %vm197_vm0, %v195_v23 }
  0xbb   :  { %355 = vmatpush.msrb.mxu2 %v1414_v25 }
  0xbd   :  { %356 = vmatpush.msrb.mxu2 %v1420_v26 }
  0xbf   :  { %357 = vmatpush.msrb.mxu2 %v1426_v27 }
  0xc1   :  { %358 = vmatpush.msrb.mxu2 %v1432_v28 }
  0xc2   :  { %1019 = vmatmul.msk.f32.vlgmr.msrb.gmra.mxu2 %vm250_vm1, %v1394_v17 }
  0xc3   :  { %431 = vmatpush.msra.mxu2 %v1469_v34 }
  0xc5   :  { %432 = vmatpush.msra.mxu2 %v1493_v59 }
  0xc7   :  { %433 = vmatpush.msra.mxu2 %v1499_v60 }
  0xc9   :  { %434 = vmatpush.msra.mxu2 %v1507_v61 }
  0xcb   :  { %435 = vmatpush.msra.mxu2 %v1514_v62 }
  0xcd   :  { %436 = vmatpush.msra.mxu2 %v1521_v63 }
  0xcf   :  { %437 = vmatpush.msra.mxu2 %v1528_v0 }
  0xd1   :  { %438 = vmatpush.msra.mxu2 %v1535_v1 }
  0xd3   :  { %439 = vmatpush.msra.mxu2 %v1542_v2 }
  0xd5   :  { %440 = vmatpush.msra.mxu2 %v1549_v3 }
  0xd7   :  { %441 = vmatpush.msra.mxu2 %v1556_v5 }
  0xd9   :  { %442 = vmatpush.msra.mxu2 %v1563_v6 }
  0xdb   :  { %443 = vmatpush.msra.mxu2 %v1570_v7 }
  0xdd   :  { %444 = vmatpush.msra.mxu2 %v1576_v8 }
  0xdf   :  { %445 = vmatpush.msra.mxu2 %v1584_v9 }
  0xe1   :  { %446 = vmatpush.msra.mxu2 %v1591_v10 }
  0xe3   :  { %609 = vmatpush.msrb.mxu2 %v1441_v29 }
  0xe5   :  { %610 = vmatpush.msrb.mxu2 %v1446_v30 }
  0xe7   :  { %611 = vmatpush.msrb.mxu2 %v1453_v31 }
  0xe9   :  { %612 = vmatpush.msrb.mxu2 %v1460_v32 }
 0x13d   :  { %v241_v38 = vpop.f32.mrf.mxu2 }
 0x13e   :  { %v242_v39 = vadd.f32 %v241_v38, %v218_v37 }
 0x140   :  { %v1476_v41 = vadd.f32 %v247_v40, %v242_v39 }
 0x142   :  { %v251_v42 = vsel %vm250_vm1, %v1476_v41, 0.0  ;;  %v258_v43 = vmul.f32 %v1476_v41, %v1476_v41 }
 0x143   :  { %v252_v44 = vrot.slane %v251_v42, 4 }
 0x144   :  { %v259_v45 = vsel %vm250_vm1, %v258_v43, 0.0 }
 0x145   :  { %v253_v46 = vadd.f32 %v252_v44, %v251_v42  ;;  %v260_v47 = vrot.slane %v259_v45, 4  ;;  %v360_v48 = vpop.f32.mrf.mxu2  ;;  %v331_v44 = vpop.permute.xlu2 %330 }
 0x146   :  { %384 = vmatpush.msra.mxu3 %v360_v48 }
 0x147   :  { %v254_v49 = vrot.slane %v253_v46, 2  ;;  %v261_v50 = vadd.f32 %v260_v47, %v259_v45 }
 0x149   :  { %v255_v51 = vadd.f32 %v254_v49, %v253_v46  ;;  %v262_v52 = vrot.slane %v261_v50, 2 }
 0x14b   :  { %v256_v53 = vrot.slane %v255_v51, 1  ;;  %v263_v54 = vadd.f32 %v262_v52, %v261_v50 }
 0x14d   :  { %v257_v55 = vadd.f32 %v256_v53, %v255_v51  ;;  %v264_v56 = vrot.slane %v263_v54, 1 }
 0x14f   :  { %1017 = vmatmul.msk.f32.vlgmr.msrb.gmra.mxu3 %vm250_vm1, %v257_v55  ;;  %v265_v57 = vadd.f32 %v264_v56, %v263_v54 }
 0x150   :  { %451 = vmatpush.msrb.mxu3 %v1469_v34 }
 0x151   :  { %1018 = vmatmul.msk.f32.vlgmr.msrb.gmra.mxu0 %vm250_vm1, %v265_v57 }
 0x152   :  { %452 = vmatpush.msrb.mxu3 %v1493_v59 }
 0x154   :  { %453 = vmatpush.msrb.mxu3 %v1499_v60 }
 0x156   :  { %454 = vmatpush.msrb.mxu3 %v1507_v61 }
 0x157   :  { %1020 = vmatmul.msk.f32.vlgmr.msra.gmra.mxu3 %vm197_vm0, %v365_v58 }
 0x158   :  { %455 = vmatpush.msrb.mxu3 %v1514_v62 }
 0x15a   :  { %456 = vmatpush.msrb.mxu3 %v1521_v63 }
 0x15c   :  { %457 = vmatpush.msrb.mxu3 %v1528_v0 }
 0x15e   :  { %458 = vmatpush.msrb.mxu3 %v1535_v1 }
 0x160   :  { %459 = vmatpush.msrb.mxu3 %v1542_v2 }
 0x162   :  { %460 = vmatpush.msrb.mxu3 %v1549_v3 }
 0x164   :  { %461 = vmatpush.msrb.mxu3 %v1556_v5 }
 0x166   :  { %462 = vmatpush.msrb.mxu3 %v1563_v6 }
 0x168   :  { %463 = vmatpush.msrb.mxu3 %v1570_v7 }
 0x16a   :  { %464 = vmatpush.msrb.mxu3 %v1576_v8 }
 0x16c   :  { %465 = vmatpush.msrb.mxu3 %v1584_v9 }
 0x16e   :  { %466 = vmatpush.msrb.mxu3 %v1591_v10 }
 0x170   :  { %683 = vmatpush.msra.mxu3 %v1414_v25 }
 0x172   :  { %684 = vmatpush.msra.mxu3 %v1420_v26 }
 0x174   :  { %685 = vmatpush.msra.mxu3 %v1426_v27 }
 0x176   :  { %686 = vmatpush.msra.mxu3 %v1432_v28 }
 0x1ce   :  { %v309_v13 = vpop.f32.mrf.mxu0 }
 0x1d2   :  { %v286_v11 = vpop.f32.mrf.mxu3 }
 0x1d3   :  { %v312_v12 = vmul.f32 %v286_v11, %v286_v11  ;;  %v325_v48 = vperm.slane %v286_v11, 0 }
 0x1d5   :  { %v313_v14 = vsub.f32 %v309_v13, %v312_v12  ;;  %v326_v55 = vsub.f32 %v1476_v41, %v325_v48  ;;  %v336_v12 = vpop.permute.xlu2 %335 }
 0x1d7   :  { %v314_v15 = vadd.f32 1e-08, %v313_v14 }
 0x1d9   :  { %1059 = vrsqrt.f32 %v314_v15  ;;  %vm321_vm3 = vweird.f32 %v314_v15 }
 0x1da   :  { %v386_v18 = vpop.f32.mrf.mxu3 }
 0x1db   :  { %v410_v19 = vadd.f32 %v409_v16, %v386_v18 }
 0x1dd   :  { %v1603_v22 = vadd.f32 %v415_v21, %v410_v19 }
 0x1df   :  { %v1060_v23 = vpop.eup %1059  ;;  %v418_v24 = vrot.slane %v1603_v22, 4  ;;  %v424_v33 = vmul.f32 %v1603_v22, %v1603_v22 }
 0x1e0   :  { %v316_v36 = vmul.f32 %v1060_v23, %v314_v15  ;;  %vm322_vm2 = vweird.f32 %v1060_v23 }
 0x1e1   :  { %v419_v37 = vadd.f32 %v418_v24, %v1603_v22  ;;  %v425_v38 = vrot.slane %v424_v33, 4  ;;  %vm323_vm4 = vmor %vm321_vm3, %vm322_vm2 }
 0x1e2   :  { %v317_v39 = vmul.f32 %v1060_v23, %v316_v36 }
 0x1e3   :  { %v420_v40 = vrot.slane %v419_v37, 2  ;;  %v426_v42 = vadd.f32 %v425_v38, %v424_v33 }
 0x1e4   :  { %v318_v43 = vmul.f32 0.5, %v317_v39  ;;  %v490_v39 = vpop.permute.xlu1 %489 }
 0x1e5   :  { %v421_v45 = vadd.f32 %v420_v40, %v419_v37  ;;  %v427_v46 = vrot.slane %v426_v42, 2 }
 0x1e6   :  { %v319_v47 = vsub.f32 1.5, %v318_v43 }
 0x1e7   :  { %v422_v49 = vrot.slane %v421_v45, 1  ;;  %v428_v50 = vadd.f32 %v427_v46, %v426_v42 }
 0x1e8   :  { %v320_v51 = vmul.f32 %v1060_v23, %v319_v47 }
 0x1e9   :  { %v423_v52 = vadd.f32 %v422_v49, %v421_v45  ;;  %v429_v53 = vrot.slane %v428_v50, 1 }
 0x1ea   :  { %v324_v54 = vsel %vm323_vm4, %v1060_v23, %v320_v51  ;;  %v526_v23 = vld [vmem:[#allocation11 + $0x8] sm:$0xff] }
 0x1eb   :  { %v327_v56 = vperm.slane %v324_v54, 0  ;;  %447 = vmatmul.f32.vlgmr.msra.gmra.mxu2 %v423_v52  ;;  %v430_v57 = vadd.f32 %v429_v53, %v428_v50  ;;  %v524_v53 = vld [vmem:[#allocation10 + $0x8] sm:$0xff] }
 0x1ec   :  { %v495_v48 = vpop.permute.xlu1 %494 }
 0x1ed   :  { %v328_v58 = vmul.f32 %v327_v56, %v326_v55  ;;  %467 = vmatmul.f32.vlgmr.msrb.gmra.mxu3 %v430_v57 }
 0x1ee   :  { %782 = vmatpush.msrb.mxu3 %v1469_v34 }
 0x1ef   :  { %v333_v13 = vmul.f32 %v331_v44, %v328_v58 }
 0x1f0   :  { %783 = vmatpush.msrb.mxu3 %v1493_v59 }
 0x1f1   :  { %v338_v11 = vadd.f32 %v336_v12, %v333_v13 }
 0x1f2   :  { %784 = vmatpush.msrb.mxu3 %v1499_v60 }
 0x1f3   :  { %v339_v14 = vmax.f32 %v338_v11, 0.0 }
 0x1f4   :  { %785 = vmatpush.msrb.mxu3 %v1507_v61 }
 0x1f5   :  { %v500_v15 = vadd.f32 %v339_v14, %v1394_v17 }
 0x1f6   :  { %786 = vmatpush.msrb.mxu3 %v1514_v62 }
 0x1f7   :  { %545 = vmatpush.msra.mxu0 %v500_v15  ;;  %1027 = vmatmul.msk.f32.vlgmr.msra.gmra.mxu3 %vm250_vm1, %v500_v15 }
 0x1f8   :  { %787 = vmatpush.msrb.mxu3 %v1521_v63  ;;  %1023 = vmatmul.msk.f32.vlgmr.msra.gmra.mxu0 %vm197_vm0, %v526_v23 }
 0x1fa   :  { %788 = vmatpush.msrb.mxu3 %v1528_v0 }
 0x1fc   :  { %789 = vmatpush.msrb.mxu3 %v1535_v1 }
 0x1fe   :  { %790 = vmatpush.msrb.mxu3 %v1542_v2 }
 0x200   :  { %791 = vmatpush.msrb.mxu3 %v1549_v3 }
 0x202   :  { %792 = vmatpush.msrb.mxu3 %v1556_v5 }
 0x204   :  { %793 = vmatpush.msrb.mxu3 %v1563_v6 }
 0x206   :  { %794 = vmatpush.msrb.mxu3 %v1570_v7 }
 0x208   :  { %795 = vmatpush.msrb.mxu3 %v1576_v8 }
 0x20a   :  { %796 = vmatpush.msrb.mxu3 %v1584_v9 }
 0x20c   :  { %797 = vmatpush.msrb.mxu3 %v1591_v10 }
 0x26e   :  { %v448_v41 = vpop.f32.mrf.mxu2 }
 0x26f   :  { %v471_v16 = vmul.f32 %v448_v41, %v448_v41  ;;  %v484_v42 = vperm.slane %v448_v41, 0 }
 0x270   :  { %v468_v18 = vpop.f32.mrf.mxu3 }
 0x271   :  { %v472_v19 = vsub.f32 %v468_v18, %v471_v16  ;;  %v485_v45 = vsub.f32 %v1603_v22, %v484_v42 }
 0x273   :  { %v473_v21 = vadd.f32 1e-08, %v472_v19 }
 0x275   :  { %1061 = vrsqrt.f32 %v473_v21  ;;  %vm480_vm6 = vweird.f32 %v473_v21 }
 0x27a   :  { %v688_v24 = vpop.f32.mrf.mxu3 }
 0x27b   :  { %v1062_v33 = vpop.eup %1061  ;;  %715 = vmatpush.msra.mxu1 %v688_v24 }
 0x27c   :  { %v475_v36 = vmul.f32 %v1062_v33, %v473_v21  ;;  %vm481_vm5 = vweird.f32 %v1062_v33  ;;  %v694_v21 = vld [vmem:[#allocation7 + $0x8] sm:$0xff] }
 0x27d   :  { %vm482_vm7 = vmor %vm480_vm6, %vm481_vm5 }
 0x27e   :  { %v476_v37 = vmul.f32 %v1062_v33, %v475_v36 }
 0x280   :  { %v477_v38 = vmul.f32 0.5, %v476_v37 }
 0x282   :  { %v478_v40 = vsub.f32 1.5, %v477_v38 }
 0x284   :  { %v479_v43 = vmul.f32 %v1062_v33, %v478_v40 }
 0x286   :  { %v483_v44 = vsel %vm482_vm7, %v1062_v33, %v479_v43 }
 0x287   :  { %v486_v46 = vperm.slane %v483_v44, 0 }
 0x289   :  { %v487_v47 = vmul.f32 %v486_v46, %v485_v45 }
 0x28b   :  { %v492_v49 = vmul.f32 %v490_v39, %v487_v47 }
 0x28d   :  { %v497_v50 = vadd.f32 %v495_v48, %v492_v49 }
 0x28f   :  { %v498_v51 = vmax.f32 %v497_v50, 0.0 }
 0x291   :  { %v499_v52 = vadd.f32 %v498_v51, %v1354_v4 }
 0x293   :  { %517 = vmatmul.f32.vlgmr.msrb.gmra.mxu1 %v499_v52  ;;  %738 = vmatpush.msra.mxu2 %v499_v52 }
 0x294   :  { %847 = vmatpush.msrb.mxu1 %v1414_v25  ;;  %v547_v25 = vpop.f32.mrf.mxu0 }
 0x296   :  { %848 = vmatpush.msrb.mxu1 %v1420_v26  ;;  %v696_v26 = vld [vmem:[#allocation8 + $0x8] sm:$0xff] }
 0x298   :  { %849 = vmatpush.msrb.mxu1 %v1426_v27  ;;  %v1028_v27 = vld [vmem:[%s1722_s4 + $0x8] sm:$0xff] }
 0x299   :  { %745 = vperm.xlu1 %1052, %v1028_v27   ;;  %825 = vperm.xlu2 %1056, %v1028_v27  }
 0x29a   :  { %850 = vmatpush.msrb.mxu1 %v1432_v28  ;;  %v1032_v28 = vld [vmem:[%s1722_s4 + $0x10] sm:$0xff]  ;;  %s1258_s4 = smov [#allocation13]  }
 0x29b   :  { %1029 = vmatmul.msk.f32.vlgmr.msra.gmra.mxu1 %vm197_vm0, %v696_v26  ;;  %989 = vperm.xlu0 %1054, %v1032_v28   ;;  %s1000_s19 = sshll.u32 %s1258_s4, 4  ;;  %s1001_s19 = int_to_ptr.vmem [resolvable:$true] %s1000_s19 }
 0x2a1   :  { %1055 = vset.pattern.permute.xlu1 %v1256_v35  ;;  %1058 = vset.pattern.permute.xlu2 %v1256_v35 }
 0x2a2   :  { %820 = vperm.xlu1 %1055, %v1028_v27   ;;  %984 = vperm.xlu2 %1058, %v1032_v28  }
 0x2aa   :  { %1057 = vset.pattern.permute.xlu1 %v1255_v20 }
 0x2ab   :  { %909 = vperm.xlu1 %1057, %v1032_v28  }
 0x30b   :  { %v746_v39 = vpop.permute.xlu1 %745 }
 0x310   :  { %v518_v22 = vpop.f32.mrf.mxu1 }
 0x311   :  { %568 = vmatpush.msrb.mxu0 %v518_v22 }
 0x312   :  { %1024 = vmatmul.msk.f32.vlgmr.msrb.gmra.mxu0 %vm197_vm0, %v524_v53 }
 0x313   :  { %632 = vmatpush.msra.mxu0 %v1441_v29 }
 0x315   :  { %633 = vmatpush.msra.mxu0 %v1446_v30 }
 0x317   :  { %634 = vmatpush.msra.mxu0 %v1453_v31  ;;  %v576_v31 = vpop.permute.xlu0 %575 }
 0x318   :  { %v717_v38 = vpop.f32.mrf.mxu1 }
 0x319   :  { %635 = vmatpush.msra.mxu0 %v1460_v32 }
 0x31b   :  { %762 = vmatpush.msrb.mxu0 %v1469_v34 }
 0x31d   :  { %763 = vmatpush.msrb.mxu0 %v1493_v59 }
 0x31f   :  { %764 = vmatpush.msrb.mxu0 %v1499_v60 }
 0x321   :  { %765 = vmatpush.msrb.mxu0 %v1507_v61 }
 0x323   :  { %766 = vmatpush.msrb.mxu0 %v1514_v62 }
 0x325   :  { %767 = vmatpush.msrb.mxu0 %v1521_v63 }
 0x327   :  { %768 = vmatpush.msrb.mxu0 %v1528_v0 }
 0x329   :  { %769 = vmatpush.msrb.mxu0 %v1535_v1 }
 0x32b   :  { %770 = vmatpush.msrb.mxu0 %v1542_v2 }
 0x32d   :  { %771 = vmatpush.msrb.mxu0 %v1549_v3 }
 0x32f   :  { %772 = vmatpush.msrb.mxu0 %v1556_v5 }
 0x331   :  { %773 = vmatpush.msrb.mxu0 %v1563_v6 }
 0x333   :  { %774 = vmatpush.msrb.mxu0 %v1570_v7 }
 0x335   :  { %775 = vmatpush.msrb.mxu0 %v1576_v8 }
 0x337   :  { %776 = vmatpush.msrb.mxu0 %v1584_v9 }
 0x339   :  { %777 = vmatpush.msrb.mxu0 %v1591_v10 }
 0x38f   :  { %v570_v29 = vpop.f32.mrf.mxu0 }
 0x390   :  { %v571_v30 = vadd.f32 %v570_v29, %v547_v25 }
 0x392   :  { %v578_v32 = vadd.f32 %v576_v31, %v571_v30 }
 0x394   :  { %v579_v54 = vsel %vm250_vm1, %v578_v32, 0.0  ;;  %v586_v55 = vmul.f32 %v578_v32, %v578_v32 }
 0x395   :  { %v580_v56 = vrot.slane %v579_v54, 4 }
 0x396   :  { %v587_v57 = vsel %vm250_vm1, %v586_v55, 0.0 }
 0x397   :  { %v581_v58 = vadd.f32 %v580_v56, %v579_v54  ;;  %v588_v12 = vrot.slane %v587_v57, 4 }
 0x399   :  { %v582_v13 = vrot.slane %v581_v58, 2  ;;  %v589_v11 = vadd.f32 %v588_v12, %v587_v57 }
 0x39b   :  { %v583_v14 = vadd.f32 %v582_v13, %v581_v58  ;;  %v590_v15 = vrot.slane %v589_v11, 2  ;;  %v659_v58 = vpop.permute.xlu2 %658  ;;  %v664_v13 = vpop.permute.xlu0 %663 }
 0x39d   :  { %v584_v41 = vrot.slane %v583_v14, 1  ;;  %v591_v16 = vadd.f32 %v590_v15, %v589_v11 }
 0x39f   :  { %v585_v18 = vadd.f32 %v584_v41, %v583_v14  ;;  %v592_v35 = vrot.slane %v591_v16, 1 }
 0x3a1   :  { %1025 = vmatmul.msk.f32.vlgmr.msrb.gmra.mxu2 %vm250_vm1, %v585_v18  ;;  %v593_v19 = vadd.f32 %v592_v35, %v591_v16 }
 0x3a3   :  { %1026 = vmatmul.msk.f32.vlgmr.msra.gmra.mxu0 %vm250_vm1, %v593_v19 }
 0x3a9   :  { %1030 = vmatmul.msk.f32.vlgmr.msra.gmra.mxu2 %vm197_vm0, %v694_v21 }
 0x420   :  { %v637_v33 = vpop.f32.mrf.mxu0 }
 0x424   :  { %v614_v23 = vpop.f32.mrf.mxu2 }
 0x425   :  { %v640_v24 = vmul.f32 %v614_v23, %v614_v23  ;;  %v653_v26 = vperm.slane %v614_v23, 0 }
 0x427   :  { %v641_v36 = vsub.f32 %v637_v33, %v640_v24  ;;  %v654_v55 = vsub.f32 %v578_v32, %v653_v26  ;;  %v860_v32 = vld [vmem:[#allocation8 + $0x10] sm:$0xff] }
 0x429   :  { %v642_v37 = vadd.f32 1e-08, %v641_v36 }
 0x42b   :  { %1063 = vrsqrt.f32 %v642_v37  ;;  %vm649_vm9 = vweird.f32 %v642_v37 }
 0x42c   :  { %v740_v20 = vpop.f32.mrf.mxu2 }
 0x42d   :  { %v741_v40 = vadd.f32 %v740_v20, %v717_v38 }
 0x42f   :  { %v1671_v42 = vadd.f32 %v746_v39, %v741_v40 }
 0x431   :  { %v1064_v43 = vpop.eup %1063  ;;  %v749_v44 = vrot.slane %v1671_v42, 4  ;;  %v755_v45 = vmul.f32 %v1671_v42, %v1671_v42 }
 0x432   :  { %v644_v46 = vmul.f32 %v1064_v43, %v642_v37  ;;  %vm650_vm8 = vweird.f32 %v1064_v43 }
 0x433   :  { %v750_v47 = vadd.f32 %v749_v44, %v1671_v42  ;;  %v756_v48 = vrot.slane %v755_v45, 4  ;;  %vm651_vm10 = vmor %vm649_vm9, %vm650_vm8  ;;  %v821_v44 = vpop.permute.xlu1 %820 }
 0x434   :  { %v645_v49 = vmul.f32 %v1064_v43, %v644_v46  ;;  %v826_v46 = vpop.permute.xlu2 %825 }
 0x435   :  { %v751_v50 = vrot.slane %v750_v47, 2  ;;  %v757_v51 = vadd.f32 %v756_v48, %v755_v45 }
 0x436   :  { %v646_v52 = vmul.f32 0.5, %v645_v49 }
 0x437   :  { %v752_v53 = vadd.f32 %v751_v50, %v750_v47  ;;  %v758_v22 = vrot.slane %v757_v51, 2 }
 0x438   :  { %v647_v25 = vsub.f32 1.5, %v646_v52 }
 0x439   :  { %v753_v27 = vrot.slane %v752_v53, 1  ;;  %v759_v28 = vadd.f32 %v758_v22, %v757_v51 }
 0x43a   :  { %v648_v29 = vmul.f32 %v1064_v43, %v647_v25 }
 0x43b   :  { %v754_v30 = vadd.f32 %v753_v27, %v752_v53  ;;  %v760_v31 = vrot.slane %v759_v28, 1 }
 0x43c   :  { %v652_v54 = vsel %vm651_vm10, %v1064_v43, %v648_v29 }
 0x43d   :  { %778 = vmatmul.f32.vlgmr.msrb.gmra.mxu0 %v754_v30  ;;  %v761_v56 = vadd.f32 %v760_v31, %v759_v28  ;;  %v655_v57 = vperm.slane %v652_v54, 0 }
 0x43f   :  { %798 = vmatmul.f32.vlgmr.msrb.gmra.mxu3 %v761_v56  ;;  %v656_v12 = vmul.f32 %v655_v57, %v654_v55 }
 0x441   :  { %v661_v11 = vmul.f32 %v659_v58, %v656_v12  ;;  %v985_v12 = vpop.permute.xlu2 %984 }
 0x443   :  { %v666_v14 = vadd.f32 %v664_v13, %v661_v11 }
 0x445   :  { %v667_v15 = vmax.f32 %v666_v14, 0.0  ;;  %v990_v14 = vpop.permute.xlu0 %989 }
 0x447   :  { %v831_v41 = vadd.f32 %v667_v15, %v1394_v17 }
 0x449   :  { %1031 = vmatmul.msk.f32.vlgmr.msrb.gmra.mxu1 %vm250_vm1, %v831_v41 }
 0x4ba   :  { %v779_v16 = vpop.f32.mrf.mxu0 }
 0x4bb   :  { %v802_v18 = vmul.f32 %v779_v16, %v779_v16  ;;  %v815_v38 = vperm.slane %v779_v16, 0 }
 0x4bd   :  { %v816_v40 = vsub.f32 %v1671_v42, %v815_v38  ;;  %v858_v42 = vld [vmem:[#allocation7 + $0x10] sm:$0xff] }
 0x4c2   :  { %v799_v35 = vpop.f32.mrf.mxu3 }
 0x4c3   :  { %v803_v19 = vsub.f32 %v799_v35, %v802_v18 }
 0x4c5   :  { %v804_v21 = vadd.f32 1e-08, %v803_v19 }
 0x4c6   :  { %v852_v23 = vpop.f32.mrf.mxu1 }
 0x4c7   :  { %1065 = vrsqrt.f32 %v804_v21  ;;  %879 = vmatpush.msrb.mxu2 %v852_v23  ;;  %vm811_vm12 = vweird.f32 %v804_v21 }
 0x4c8   :  { %1033 = vmatmul.msk.f32.vlgmr.msrb.gmra.mxu2 %vm197_vm0, %v860_v32 }
 0x4c9   :  { %926 = vmatpush.msra.mxu2 %v1469_v34 }
 0x4cb   :  { %927 = vmatpush.msra.mxu2 %v1493_v59 }
 0x4cd   :  { %v1066_v24 = vpop.eup %1065  ;;  %928 = vmatpush.msra.mxu2 %v1499_v60 }
 0x4ce   :  { %v806_v17 = vmul.f32 %v1066_v24, %v804_v21  ;;  %vm812_vm11 = vweird.f32 %v1066_v24 }
 0x4cf   :  { %929 = vmatpush.msra.mxu2 %v1507_v61  ;;  %vm813_vm13 = vmor %vm811_vm12, %vm812_vm11 }
 0x4d0   :  { %v807_v33 = vmul.f32 %v1066_v24, %v806_v17 }
 0x4d1   :  { %930 = vmatpush.msra.mxu2 %v1514_v62 }
 0x4d2   :  { %v808_v36 = vmul.f32 0.5, %v807_v33 }
 0x4d3   :  { %931 = vmatpush.msra.mxu2 %v1521_v63 }
 0x4d4   :  { %v809_v37 = vsub.f32 1.5, %v808_v36 }
 0x4d5   :  { %932 = vmatpush.msra.mxu2 %v1528_v0 }
 0x4d6   :  { %v810_v20 = vmul.f32 %v1066_v24, %v809_v37 }
 0x4d7   :  { %933 = vmatpush.msra.mxu2 %v1535_v1 }
 0x4d8   :  { %v814_v39 = vsel %vm813_vm13, %v1066_v24, %v810_v20 }
 0x4d9   :  { %v817_v43 = vperm.slane %v814_v39, 0  ;;  %934 = vmatpush.msra.mxu2 %v1542_v2 }
 0x4db   :  { %v818_v45 = vmul.f32 %v817_v43, %v816_v40  ;;  %935 = vmatpush.msra.mxu2 %v1549_v3 }
 0x4dd   :  { %v823_v47 = vmul.f32 %v821_v44, %v818_v45  ;;  %936 = vmatpush.msra.mxu2 %v1556_v5 }
 0x4df   :  { %v828_v48 = vadd.f32 %v826_v46, %v823_v47  ;;  %937 = vmatpush.msra.mxu2 %v1563_v6 }
 0x4e1   :  { %v829_v49 = vmax.f32 %v828_v48, 0.0  ;;  %938 = vmatpush.msra.mxu2 %v1570_v7 }
 0x4e3   :  { %v830_v50 = vadd.f32 %v829_v49, %v1354_v4  ;;  %939 = vmatpush.msra.mxu2 %v1576_v8 }
 0x4e5   :  { %902 = vmatpush.msra.mxu1 %v830_v50  ;;  %940 = vmatpush.msra.mxu2 %v1584_v9 }
 0x4e6   :  { %1034 = vmatmul.msk.f32.vlgmr.msra.gmra.mxu1 %vm197_vm0, %v858_v42 }
 0x4e7   :  { %946 = vmatpush.msrb.mxu1 %v1469_v34  ;;  %941 = vmatpush.msra.mxu2 %v1591_v10 }
 0x4e9   :  { %947 = vmatpush.msrb.mxu1 %v1493_v59  ;;  %v910_v59 = vpop.permute.xlu1 %909 }
 0x4eb   :  { %948 = vmatpush.msrb.mxu1 %v1499_v60 }
 0x4ed   :  { %949 = vmatpush.msrb.mxu1 %v1507_v61 }
 0x4ef   :  { %950 = vmatpush.msrb.mxu1 %v1514_v62 }
 0x4f1   :  { %951 = vmatpush.msrb.mxu1 %v1521_v63 }
 0x4f3   :  { %952 = vmatpush.msrb.mxu1 %v1528_v0 }
 0x4f5   :  { %953 = vmatpush.msrb.mxu1 %v1535_v1 }
 0x4f7   :  { %954 = vmatpush.msrb.mxu1 %v1542_v2 }
 0x4f9   :  { %955 = vmatpush.msrb.mxu1 %v1549_v3 }
 0x4fb   :  { %956 = vmatpush.msrb.mxu1 %v1556_v5 }
 0x4fd   :  { %957 = vmatpush.msrb.mxu1 %v1563_v6 }
 0x4ff   :  { %958 = vmatpush.msrb.mxu1 %v1570_v7 }
 0x501   :  { %959 = vmatpush.msrb.mxu1 %v1576_v8 }
 0x503   :  { %960 = vmatpush.msrb.mxu1 %v1584_v9 }
 0x505   :  { %961 = vmatpush.msrb.mxu1 %v1591_v10 }
 0x54b   :  { %v881_v4 = vpop.f32.mrf.mxu2 }
 0x563   :  { %v904_v34 = vpop.f32.mrf.mxu1 }
 0x564   :  { %v905_v60 = vadd.f32 %v904_v34, %v881_v4 }
 0x566   :  { %v912_v61 = vadd.f32 %v910_v59, %v905_v60 }
 0x568   :  { %v913_v62 = vrot.slane %v912_v61, 4  ;;  %v919_v63 = vmul.f32 %v912_v61, %v912_v61 }
 0x56a   :  { %v914_v0 = vadd.f32 %v913_v62, %v912_v61  ;;  %v920_v1 = vrot.slane %v919_v63, 4 }
 0x56c   :  { %v915_v2 = vrot.slane %v914_v0, 2  ;;  %v921_v3 = vadd.f32 %v920_v1, %v919_v63 }
 0x56e   :  { %v916_v5 = vadd.f32 %v915_v2, %v914_v0  ;;  %v922_v6 = vrot.slane %v921_v3, 2 }
 0x570   :  { %v917_v7 = vrot.slane %v916_v5, 1  ;;  %v923_v51 = vadd.f32 %v922_v6, %v921_v3 }
 0x572   :  { %v918_v8 = vadd.f32 %v917_v7, %v916_v5  ;;  %v924_v52 = vrot.slane %v923_v51, 1 }
 0x574   :  { %942 = vmatmul.f32.vlgmr.msra.gmra.mxu2 %v918_v8  ;;  %v925_v9 = vadd.f32 %v924_v52, %v923_v51 }
 0x576   :  { %962 = vmatmul.f32.vlgmr.msrb.gmra.mxu1 %v925_v9 }
 0x5f3   :  { %v963_v22 = vpop.f32.mrf.mxu1 }
 0x5f7   :  { %v943_v10 = vpop.f32.mrf.mxu2 }
 0x5f8   :  { %v966_v53 = vmul.f32 %v943_v10, %v943_v10  ;;  %v979_v54 = vperm.slane %v943_v10, 0 }
 0x5fa   :  { %v967_v25 = vsub.f32 %v963_v22, %v966_v53  ;;  %v980_v57 = vsub.f32 %v912_v61, %v979_v54 }
 0x5fc   :  { %v968_v26 = vadd.f32 1e-08, %v967_v25 }
 0x5fe   :  { %1067 = vrsqrt.f32 %v968_v26  ;;  %vm975_vm15 = vweird.f32 %v968_v26 }
 0x604   :  { %v1068_v27 = vpop.eup %1067 }
 0x605   :  { %v970_v28 = vmul.f32 %v1068_v27, %v968_v26  ;;  %vm976_vm14 = vweird.f32 %v1068_v27 }
 0x606   :  { %vm977_vm0 = vmor %vm975_vm15, %vm976_vm14 }
 0x607   :  { %v971_v29 = vmul.f32 %v1068_v27, %v970_v28 }
 0x609   :  { %v972_v30 = vmul.f32 0.5, %v971_v29 }
 0x60b   :  { %v973_v31 = vsub.f32 1.5, %v972_v30 }
 0x60d   :  { %v974_v55 = vmul.f32 %v1068_v27, %v973_v31 }
 0x60f   :  { %v978_v56 = vsel %vm977_vm0, %v1068_v27, %v974_v55 }
 0x610   :  { %v981_v58 = vperm.slane %v978_v56, 0 }
 0x612   :  { %v982_v13 = vmul.f32 %v981_v58, %v980_v57 }
 0x614   :  { %v987_v11 = vmul.f32 %v985_v12, %v982_v13 }
 0x616   :  { %v992_v15 = vadd.f32 %v990_v14, %v987_v11 }
 0x618   :  { %v993_v41 = vmax.f32 %v992_v15, 0.0 }
 0x61a   :  { %994 = vst [vmem:[#allocation13] sm:$0xff] %v993_v41 }
 0x61b   :  { %1005 = dma.vmem_to_hbm [thread:$0]  %s1001_s19, 128, %s1003_s21, [#allocation4]  }
 0x61c   :  { %1245 = dma.done.wait [#allocation4], 128  }
 0x61d   :  { %1246 = vsyncadd [#allocation4], 4294967168 }
 0x61e   :  { %1010 = vsyncpa [#allocation3], 1 }
 0x61f   :  { %1011 = vsyncpa [#allocation6], 1 }
 0x620   :  { %1012 = vsyncpa [#allocation9], 1 }
 0x621   :  { %1013 = vsyncpa [#allocation12], 1 }
 0x622   :  { %1014 = vsyncpa [#allocation4], 1 }

</bundles_post_ra>
